<compile_context>
chip_gen: v7x
topology: tpu7x:2x2x1
jax: 0.10.0
libtpu: 0.0.40
codegen_flags: <defaults>
</compile_context>

<pallas_src>
import jax
import jax.numpy as jnp
from jax import lax
from jax.experimental import pallas as pl
from jax.experimental.pallas import tpu as pltpu  # noqa: F401

# ---------------- model hyper-parameters (small, synthetic) ----------------
B = 2          # batch
S = 8          # target sequence length
SE = 8         # encoder (source) sequence length
D_MODEL = 32   # d_model
NUM_HEADS = 4  # heads
D_K = D_MODEL // NUM_HEADS
D_FF = 64      # feed-forward hidden size
LN_EPS = 1e-5
NEG_INF = -1e9


# ------------------------------- kernel ------------------------------------
def decoder_layer_kernel(
    x_ref,         # (B*S, D)
    enc_ref,       # (B*SE, D)
    tgt_bias_ref,  # (B*S, B*S)   block-diagonal additive mask bias (0 / -1e9)
    src_bias_ref,  # (B*S, B*SE)
    attn_ref,      # (2, D+1, 4D) [self, cross]; rows 0..D-1 = W, row D = bias
                   #   lanes [0:D]=Wq*scale  [D:2D]=Wk  [2D:3D]=Wv  [3D:4D]=Wo
    ln_ref,        # (6, D)  rows 0..2 = gains (norm1..3), rows 3..5 = biases
    w1_ref,        # (D, D_FF)
    w2_ref,        # (D_FF, D)
    ffn_b_ref,     # (1, D_FF + D)  [b1 | b2]
    out_ref,       # (B*S, D)
):
    f32 = jnp.float32
    D = D_MODEL

    def layer_norm(v, idx):
        g = ln_ref[idx:idx + 1, :]          # (1, D) static sublane slice
        b = ln_ref[idx + 3:idx + 4, :]
        mu = jnp.mean(v, axis=-1, keepdims=True)
        var = jnp.mean(jnp.square(v - mu), axis=-1, keepdims=True)
        return (v - mu) * lax.rsqrt(var + LN_EPS) * g + b

    def mha(q_rows, kv_rows, a_idx, bias, self_attn):
        wb = attn_ref[a_idx]                # (D+1, 4D), leading-dim index only
        w = wb[0:D, :]                      # (D, 4D)
        bv = wb[D:D + 1, :]                 # (1, 4D)

        # Fused projections (scale already folded into the Q columns/bias).
        if self_attn:
            qkv = jnp.dot(q_rows, w[:, 0:3 * D],
                          preferred_element_type=f32) + bv[:, 0:3 * D]
            q_all, k_all, v_all = qkv[:, 0:D], qkv[:, D:2 * D], qkv[:, 2 * D:3 * D]
        else:
            q_all = jnp.dot(q_rows, w[:, 0:D],
                            preferred_element_type=f32) + bv[:, 0:D]
            kv = jnp.dot(kv_rows, w[:, D:3 * D],
                         preferred_element_type=f32) + bv[:, D:3 * D]
            k_all, v_all = kv[:, 0:D], kv[:, D:2 * D]

        # Per-head: one score matmul / softmax / PV matmul for ALL batches,
        # using the block-diagonal bias to keep batches from attending to
        # each other.
        heads = []
        for h in range(NUM_HEADS):
            qh = q_all[:, h * D_K:(h + 1) * D_K]    # (B*Sq, D_K)
            kh = k_all[:, h * D_K:(h + 1) * D_K]    # (B*Sk, D_K)
            vh = v_all[:, h * D_K:(h + 1) * D_K]
            s = lax.dot_general(qh, kh, (((1,), (1,)), ((), ())),
                                preferred_element_type=f32) + bias
            s = s - jnp.max(s, axis=-1, keepdims=True)
            p = jnp.exp(s)
            p = p * pl.reciprocal(jnp.sum(p, axis=-1, keepdims=True), approx=True)
            heads.append(jnp.dot(p, vh, preferred_element_type=f32))

        ctx = jnp.concatenate(heads, axis=-1)       # (B*Sq, D) lane concat
        return jnp.dot(ctx, w[:, 3 * D:4 * D],
                       preferred_element_type=f32) + bv[:, 3 * D:4 * D]

    x = x_ref[...].astype(f32)        # (B*S, D)
    enc = enc_ref[...].astype(f32)    # (B*SE, D)

    # ---- self attention + add & norm (dropout == identity) ----
    attn = mha(x, x, 0, tgt_bias_ref[...], True)
    x1 = layer_norm(x + attn, 0)

    # ---- cross attention + add & norm ----
    cross = mha(x1, enc, 1, src_bias_ref[...], False)
    x2 = layer_norm(x1 + cross, 1)

    # ---- feed forward + add & norm ----
    hdn = jnp.dot(x2, w1_ref[...], preferred_element_type=f32) + ffn_b_ref[:, 0:D_FF]
    hdn = jnp.maximum(hdn, 0.0)       # ReLU
    ff = jnp.dot(hdn, w2_ref[...], preferred_element_type=f32) + ffn_b_ref[:, D_FF:D_FF + D]
    x3 = layer_norm(x2 + ff, 2)

    out_ref[...] = x3.astype(out_ref.dtype)


# ------------------------------ wrapper -------------------------------------
def _pack_attention(w4, b4):
    # w4: (4, D, D) in q,k,v,o order (in_features, out_features); b4: (4, D).
    # Fold the 1/sqrt(D_K) attention scale into the Q weights AND Q bias.
    scale = jnp.float32(D_K ** -0.5)
    w = jnp.concatenate([w4[0] * scale, w4[1], w4[2], w4[3]], axis=1)        # (D, 4D)
    b = jnp.concatenate([b4[0] * scale, b4[1], b4[2], b4[3]], axis=0)[None]  # (1, 4D)
    return jnp.concatenate([w, b], axis=0)                                   # (D+1, 4D)


def _block_diag_bias(mask, batch):
    # mask: (Sq, Sk) with 1.0 = attend, 0.0 = masked  ->  (B*Sq, B*Sk) additive
    # bias with -1e9 on cross-batch blocks (exact in f32: 1e9 is representable).
    blk = jnp.where(mask == 0.0, NEG_INF, 0.0).astype(jnp.float32)
    return jnp.kron(jnp.eye(batch, dtype=jnp.float32), blk + 1e9) - 1e9


@jax.jit
def decoder_layer(x, enc, tgt_mask, src_mask, params):
    Bs, Ss, D = x.shape
    SEs = enc.shape[1]

    # Flatten batch into rows (free reshape; S == sublane tile of 8).
    x_rows = x.reshape(Bs * Ss, D)
    enc_rows = enc.reshape(Bs * SEs, D)

    tgt_bias = _block_diag_bias(tgt_mask, Bs)     # (B*S, B*S)
    src_bias = _block_diag_bias(src_mask, Bs)     # (B*S, B*SE)

    attn_pack = jnp.stack([
        _pack_attention(params["w_self"], params["b_self"]),
        _pack_attention(params["w_cross"], params["b_cross"]),
    ])                                            # (2, D+1, 4D)
    ln_pack = jnp.concatenate([params["ln_g"], params["ln_b"]], axis=0)   # (6, D)
    ffn_b = jnp.concatenate([params["b1"], params["b2"]], axis=1)         # (1, D_FF+D)

    # Single invocation, no grid: every operand is one whole-array VMEM block
    # (total resident data is tens of KiB, far under any VMEM limit).
    out_rows = pl.pallas_call(
        decoder_layer_kernel,
        out_shape=jax.ShapeDtypeStruct((Bs * Ss, D), jnp.float32),
    )(x_rows, enc_rows, tgt_bias, src_bias,
      attn_pack, ln_pack, params["w1"], params["w2"], ffn_b)

    return out_rows.reshape(Bs, Ss, D)


# ----------------------- pure-JAX reference (for check) ---------------------
def reference(x, enc, tgt_mask, src_mask, p):
    def ln(v, g, b):
        mu = jnp.mean(v, axis=-1, keepdims=True)
        var = jnp.mean((v - mu) ** 2, axis=-1, keepdims=True)
        return (v - mu) / jnp.sqrt(var + LN_EPS) * g + b

    def mha(q_in, kv_in, w, b, mask):
        q = q_in @ w[0] + b[0]
        k = kv_in @ w[1] + b[1]
        v = kv_in @ w[2] + b[2]
        Bq, Sq, _ = q.shape
        Sk = k.shape[1]
        qh = q.reshape(Bq, Sq, NUM_HEADS, D_K).transpose(0, 2, 1, 3)
        kh = k.reshape(Bq, Sk, NUM_HEADS, D_K).transpose(0, 2, 1, 3)
        vh = v.reshape(Bq, Sk, NUM_HEADS, D_K).transpose(0, 2, 1, 3)
        scores = jnp.einsum("bhqd,bhkd->bhqk", qh, kh) / jnp.sqrt(jnp.float32(D_K))
        scores = jnp.where(mask[None, None] == 0.0, -1e9, scores)
        pr = jax.nn.softmax(scores, axis=-1)
        o = jnp.einsum("bhqk,bhkd->bhqd", pr, vh)
        o = o.transpose(0, 2, 1, 3).reshape(Bq, Sq, D_MODEL)
        return o @ w[3] + b[3]

    a = mha(x, x, p["w_self"], p["b_self"], tgt_mask)
    x1 = ln(x + a, p["ln_g"][0], p["ln_b"][0])
    c = mha(x1, enc, p["w_cross"], p["b_cross"], src_mask)
    x2 = ln(x1 + c, p["ln_g"][1], p["ln_b"][1])
    ff = jnp.maximum(x2 @ p["w1"] + p["b1"][0], 0.0) @ p["w2"] + p["b2"][0]
    return ln(x2 + ff, p["ln_g"][2], p["ln_b"][2])


# ------------------------------- main ---------------------------------------
if __name__ == "__main__":
    key = jax.random.PRNGKey(0)
    ks = jax.random.split(key, 12)

    params = {
        "w_self": 0.05 * jax.random.normal(ks[0], (4, D_MODEL, D_MODEL), jnp.float32),
        "b_self": 0.01 * jax.random.normal(ks[1], (4, D_MODEL), jnp.float32),
        "w_cross": 0.05 * jax.random.normal(ks[2], (4, D_MODEL, D_MODEL), jnp.float32),
        "b_cross": 0.01 * jax.random.normal(ks[3], (4, D_MODEL), jnp.float32),
        "ln_g": jnp.ones((3, D_MODEL), jnp.float32),
        "ln_b": jnp.zeros((3, D_MODEL), jnp.float32),
        "w1": 0.05 * jax.random.normal(ks[4], (D_MODEL, D_FF), jnp.float32),
        "b1": 0.01 * jax.random.normal(ks[5], (1, D_FF), jnp.float32),
        "w2": 0.05 * jax.random.normal(ks[6], (D_FF, D_MODEL), jnp.float32),
        "b2": 0.01 * jax.random.normal(ks[7], (1, D_MODEL), jnp.float32),
    }

    x = jax.random.normal(ks[8], (B, S, D_MODEL), jnp.float32)
    enc = jax.random.normal(ks[9], (B, SE, D_MODEL), jnp.float32)
    # causal target mask, all-ones source mask (1.0 = attend, 0.0 = masked)
    tgt_mask = jnp.tril(jnp.ones((S, S), jnp.float32))
    src_mask = jnp.ones((S, SE), jnp.float32)

    out = decoder_layer(x, enc, tgt_mask, src_mask, params)
    out = jax.block_until_ready(out)

    ref = reference(x, enc, tgt_mask, src_mask, params)
    assert out.shape == (B, S, D_MODEL)
    # Tolerance accommodates the EUP approximate-reciprocal softmax divide;
    # genuine semantic bugs produce O(0.1 - 1) errors, far above this.
    assert jnp.allclose(out, ref, rtol=5e-3, atol=5e-3), \
        f"max abs err {jnp.max(jnp.abs(out - ref))}"

    print("KERNEL_OK")
</pallas_src>

<mosaic_0001>
module attributes {stable_mosaic.version = 11 : i64} {
  func.func @decoder_layer_kernel(%arg0: memref<16x32xf32, #tpu.memory_space<vmem>>, %arg1: memref<16x32xf32, #tpu.memory_space<vmem>>, %arg2: memref<16x16xf32, #tpu.memory_space<vmem>>, %arg3: memref<16x16xf32, #tpu.memory_space<vmem>>, %arg4: memref<2x33x128xf32, #tpu.memory_space<vmem>>, %arg5: memref<6x32xf32, #tpu.memory_space<vmem>>, %arg6: memref<32x64xf32, #tpu.memory_space<vmem>>, %arg7: memref<64x32xf32, #tpu.memory_space<vmem>>, %arg8: memref<1x96xf32, #tpu.memory_space<vmem>>, %arg9: memref<16x32xf32, #tpu.memory_space<vmem>>) attributes {dimension_semantics = [], scalar_prefetch = 0 : i64, scratch_operands = 0 : i64, tpu.core_type = #tpu.core_type<tc>} {
    %c0 = arith.constant 0 : index
    %c0_0 = arith.constant 0 : index
    %0 = vector.load %arg0[%c0, %c0_0] : memref<16x32xf32, #tpu.memory_space<vmem>>, vector<16x32xf32>
    %c0_1 = arith.constant 0 : index
    %c0_2 = arith.constant 0 : index
    %1 = vector.load %arg1[%c0_1, %c0_2] : memref<16x32xf32, #tpu.memory_space<vmem>>, vector<16x32xf32>
    %c0_3 = arith.constant 0 : index
    %c0_4 = arith.constant 0 : index
    %2 = vector.load %arg2[%c0_3, %c0_4] : memref<16x16xf32, #tpu.memory_space<vmem>>, vector<16x16xf32>
    %c0_5 = arith.constant 0 : index
    %c0_6 = arith.constant 0 : index
    %c0_7 = arith.constant 0 : index
    %3 = vector.load %arg4[%c0_5, %c0_6, %c0_7] : memref<2x33x128xf32, #tpu.memory_space<vmem>>, vector<1x33x128xf32>
    %4 = vector.shape_cast %3 : vector<1x33x128xf32> to vector<33x128xf32>
    %5 = vector.extract_strided_slice %4 {offsets = [0, 0], sizes = [32, 128], strides = [1, 1]} : vector<33x128xf32> to vector<32x128xf32>
    %6 = vector.extract_strided_slice %4 {offsets = [32, 0], sizes = [1, 128], strides = [1, 1]} : vector<33x128xf32> to vector<1x128xf32>
    %7 = vector.extract_strided_slice %5 {offsets = [0, 0], sizes = [32, 96], strides = [1, 1]} : vector<32x128xf32> to vector<32x96xf32>
    %cst = arith.constant dense<0.000000e+00> : vector<16x96xf32>
    %8 = tpu.matmul %0, %7, %cst {dimension_numbers = #tpu.dot_dimension_numbers<[1], [0], [0], [1], [0, 0, 1, 1], [], []>} : vector<16x32xf32>, vector<32x96xf32>, vector<16x96xf32> -> vector<16x96xf32>
    %9 = vector.extract_strided_slice %6 {offsets = [0, 0], sizes = [1, 96], strides = [1, 1]} : vector<1x128xf32> to vector<1x96xf32>
    %10 = vector.broadcast %9 : vector<1x96xf32> to vector<16x96xf32>
    %11 = arith.addf %8, %10 : vector<16x96xf32>
    %12 = vector.extract_strided_slice %11 {offsets = [0, 0], sizes = [16, 32], strides = [1, 1]} : vector<16x96xf32> to vector<16x32xf32>
    %13 = vector.extract_strided_slice %11 {offsets = [0, 32], sizes = [16, 32], strides = [1, 1]} : vector<16x96xf32> to vector<16x32xf32>
    %14 = vector.extract_strided_slice %11 {offsets = [0, 64], sizes = [16, 32], strides = [1, 1]} : vector<16x96xf32> to vector<16x32xf32>
    %15 = vector.extract_strided_slice %12 {offsets = [0, 0], sizes = [16, 8], strides = [1, 1]} : vector<16x32xf32> to vector<16x8xf32>
    %16 = vector.extract_strided_slice %13 {offsets = [0, 0], sizes = [16, 8], strides = [1, 1]} : vector<16x32xf32> to vector<16x8xf32>
    %17 = vector.extract_strided_slice %14 {offsets = [0, 0], sizes = [16, 8], strides = [1, 1]} : vector<16x32xf32> to vector<16x8xf32>
    %cst_8 = arith.constant dense<0.000000e+00> : vector<16x16xf32>
    %18 = tpu.matmul %15, %16, %cst_8 {dimension_numbers = #tpu.dot_dimension_numbers<[1], [1], [0], [0], [0, 0, 1, 0], [], []>} : vector<16x8xf32>, vector<16x8xf32>, vector<16x16xf32> -> vector<16x16xf32>
    %19 = arith.addf %18, %2 : vector<16x16xf32>
    %cst_9 = arith.constant dense<0xFF800000> : vector<16xf32>
    %20 = vector.multi_reduction <maximumf>, %19, %cst_9 [1] : vector<16x16xf32> to vector<16xf32>
    %21 = vector.shape_cast %20 : vector<16xf32> to vector<16x1xf32>
    %22 = vector.broadcast %21 : vector<16x1xf32> to vector<16x16xf32>
    %23 = arith.subf %19, %22 : vector<16x16xf32>
    %24 = math.exp %23 : vector<16x16xf32>
    %cst_10 = arith.constant dense<0.000000e+00> : vector<16xf32>
    %25 = vector.multi_reduction <add>, %24, %cst_10 [1] : vector<16x16xf32> to vector<16xf32>
    %26 = vector.shape_cast %25 : vector<16xf32> to vector<16x1xf32>
    %27 = tpu.reciprocal %26 {approx = true} : vector<16x1xf32> -> vector<16x1xf32>
    %28 = vector.broadcast %27 : vector<16x1xf32> to vector<16x16xf32>
    %29 = arith.mulf %24, %28 : vector<16x16xf32>
    %cst_11 = arith.constant dense<0.000000e+00> : vector<16x8xf32>
    %30 = tpu.matmul %29, %17, %cst_11 {dimension_numbers = #tpu.dot_dimension_numbers<[1], [0], [0], [1], [0, 0, 1, 1], [], []>} : vector<16x16xf32>, vector<16x8xf32>, vector<16x8xf32> -> vector<16x8xf32>
    %31 = vector.extract_strided_slice %12 {offsets = [0, 8], sizes = [16, 8], strides = [1, 1]} : vector<16x32xf32> to vector<16x8xf32>
    %32 = vector.extract_strided_slice %13 {offsets = [0, 8], sizes = [16, 8], strides = [1, 1]} : vector<16x32xf32> to vector<16x8xf32>
    %33 = vector.extract_strided_slice %14 {offsets = [0, 8], sizes = [16, 8], strides = [1, 1]} : vector<16x32xf32> to vector<16x8xf32>
    %cst_12 = arith.constant dense<0.000000e+00> : vector<16x16xf32>
    %34 = tpu.matmul %31, %32, %cst_12 {dimension_numbers = #tpu.dot_dimension_numbers<[1], [1], [0], [0], [0, 0, 1, 0], [], []>} : vector<16x8xf32>, vector<16x8xf32>, vector<16x16xf32> -> vector<16x16xf32>
    %35 = arith.addf %34, %2 : vector<16x16xf32>
    %cst_13 = arith.constant dense<0xFF800000> : vector<16xf32>
    %36 = vector.multi_reduction <maximumf>, %35, %cst_13 [1] : vector<16x16xf32> to vector<16xf32>
    %37 = vector.shape_cast %36 : vector<16xf32> to vector<16x1xf32>
    %38 = vector.broadcast %37 : vector<16x1xf32> to vector<16x16xf32>
    %39 = arith.subf %35, %38 : vector<16x16xf32>
    %40 = math.exp %39 : vector<16x16xf32>
    %cst_14 = arith.constant dense<0.000000e+00> : vector<16xf32>
    %41 = vector.multi_reduction <add>, %40, %cst_14 [1] : vector<16x16xf32> to vector<16xf32>
    %42 = vector.shape_cast %41 : vector<16xf32> to vector<16x1xf32>
    %43 = tpu.reciprocal %42 {approx = true} : vector<16x1xf32> -> vector<16x1xf32>
    %44 = vector.broadcast %43 : vector<16x1xf32> to vector<16x16xf32>
    %45 = arith.mulf %40, %44 : vector<16x16xf32>
    %cst_15 = arith.constant dense<0.000000e+00> : vector<16x8xf32>
    %46 = tpu.matmul %45, %33, %cst_15 {dimension_numbers = #tpu.dot_dimension_numbers<[1], [0], [0], [1], [0, 0, 1, 1], [], []>} : vector<16x16xf32>, vector<16x8xf32>, vector<16x8xf32> -> vector<16x8xf32>
    %47 = vector.extract_strided_slice %12 {offsets = [0, 16], sizes = [16, 8], strides = [1, 1]} : vector<16x32xf32> to vector<16x8xf32>
    %48 = vector.extract_strided_slice %13 {offsets = [0, 16], sizes = [16, 8], strides = [1, 1]} : vector<16x32xf32> to vector<16x8xf32>
    %49 = vector.extract_strided_slice %14 {offsets = [0, 16], sizes = [16, 8], strides = [1, 1]} : vector<16x32xf32> to vector<16x8xf32>
    %cst_16 = arith.constant dense<0.000000e+00> : vector<16x16xf32>
    %50 = tpu.matmul %47, %48, %cst_16 {dimension_numbers = #tpu.dot_dimension_numbers<[1], [1], [0], [0], [0, 0, 1, 0], [], []>} : vector<16x8xf32>, vector<16x8xf32>, vector<16x16xf32> -> vector<16x16xf32>
    %51 = arith.addf %50, %2 : vector<16x16xf32>
    %cst_17 = arith.constant dense<0xFF800000> : vector<16xf32>
    %52 = vector.multi_reduction <maximumf>, %51, %cst_17 [1] : vector<16x16xf32> to vector<16xf32>
    %53 = vector.shape_cast %52 : vector<16xf32> to vector<16x1xf32>
    %54 = vector.broadcast %53 : vector<16x1xf32> to vector<16x16xf32>
    %55 = arith.subf %51, %54 : vector<16x16xf32>
    %56 = math.exp %55 : vector<16x16xf32>
    %cst_18 = arith.constant dense<0.000000e+00> : vector<16xf32>
    %57 = vector.multi_reduction <add>, %56, %cst_18 [1] : vector<16x16xf32> to vector<16xf32>
    %58 = vector.shape_cast %57 : vector<16xf32> to vector<16x1xf32>
    %59 = tpu.reciprocal %58 {approx = true} : vector<16x1xf32> -> vector<16x1xf32>
    %60 = vector.broadcast %59 : vector<16x1xf32> to vector<16x16xf32>
    %61 = arith.mulf %56, %60 : vector<16x16xf32>
    %cst_19 = arith.constant dense<0.000000e+00> : vector<16x8xf32>
    %62 = tpu.matmul %61, %49, %cst_19 {dimension_numbers = #tpu.dot_dimension_numbers<[1], [0], [0], [1], [0, 0, 1, 1], [], []>} : vector<16x16xf32>, vector<16x8xf32>, vector<16x8xf32> -> vector<16x8xf32>
    %63 = vector.extract_strided_slice %12 {offsets = [0, 24], sizes = [16, 8], strides = [1, 1]} : vector<16x32xf32> to vector<16x8xf32>
    %64 = vector.extract_strided_slice %13 {offsets = [0, 24], sizes = [16, 8], strides = [1, 1]} : vector<16x32xf32> to vector<16x8xf32>
    %65 = vector.extract_strided_slice %14 {offsets = [0, 24], sizes = [16, 8], strides = [1, 1]} : vector<16x32xf32> to vector<16x8xf32>
    %cst_20 = arith.constant dense<0.000000e+00> : vector<16x16xf32>
    %66 = tpu.matmul %63, %64, %cst_20 {dimension_numbers = #tpu.dot_dimension_numbers<[1], [1], [0], [0], [0, 0, 1, 0], [], []>} : vector<16x8xf32>, vector<16x8xf32>, vector<16x16xf32> -> vector<16x16xf32>
    %67 = arith.addf %66, %2 : vector<16x16xf32>
    %cst_21 = arith.constant dense<0xFF800000> : vector<16xf32>
    %68 = vector.multi_reduction <maximumf>, %67, %cst_21 [1] : vector<16x16xf32> to vector<16xf32>
    %69 = vector.shape_cast %68 : vector<16xf32> to vector<16x1xf32>
    %70 = vector.broadcast %69 : vector<16x1xf32> to vector<16x16xf32>
    %71 = arith.subf %67, %70 : vector<16x16xf32>
    %72 = math.exp %71 : vector<16x16xf32>
    %cst_22 = arith.constant dense<0.000000e+00> : vector<16xf32>
    %73 = vector.multi_reduction <add>, %72, %cst_22 [1] : vector<16x16xf32> to vector<16xf32>
    %74 = vector.shape_cast %73 : vector<16xf32> to vector<16x1xf32>
    %75 = tpu.reciprocal %74 {approx = true} : vector<16x1xf32> -> vector<16x1xf32>
    %76 = vector.broadcast %75 : vector<16x1xf32> to vector<16x16xf32>
    %77 = arith.mulf %72, %76 : vector<16x16xf32>
    %cst_23 = arith.constant dense<0.000000e+00> : vector<16x8xf32>
    %78 = tpu.matmul %77, %65, %cst_23 {dimension_numbers = #tpu.dot_dimension_numbers<[1], [0], [0], [1], [0, 0, 1, 1], [], []>} : vector<16x16xf32>, vector<16x8xf32>, vector<16x8xf32> -> vector<16x8xf32>
    %79 = tpu.concatenate %30, %46, %62, %78 in 1 : vector<16x8xf32>, vector<16x8xf32>, vector<16x8xf32>, vector<16x8xf32> -> vector<16x32xf32>
    %80 = vector.extract_strided_slice %5 {offsets = [0, 96], sizes = [32, 32], strides = [1, 1]} : vector<32x128xf32> to vector<32x32xf32>
    %cst_24 = arith.constant dense<0.000000e+00> : vector<16x32xf32>
    %81 = tpu.matmul %79, %80, %cst_24 {dimension_numbers = #tpu.dot_dimension_numbers<[1], [0], [0], [1], [0, 0, 1, 1], [], []>} : vector<16x32xf32>, vector<32x32xf32>, vector<16x32xf32> -> vector<16x32xf32>
    %82 = vector.extract_strided_slice %6 {offsets = [0, 96], sizes = [1, 32], strides = [1, 1]} : vector<1x128xf32> to vector<1x32xf32>
    %83 = vector.broadcast %82 : vector<1x32xf32> to vector<16x32xf32>
    %84 = arith.addf %81, %83 : vector<16x32xf32>
    %85 = arith.addf %0, %84 : vector<16x32xf32>
    %c0_25 = arith.constant 0 : index
    %c0_26 = arith.constant 0 : index
    %86 = vector.load %arg5[%c0_25, %c0_26] : memref<6x32xf32, #tpu.memory_space<vmem>>, vector<1x32xf32>
    %c3 = arith.constant 3 : index
    %c0_27 = arith.constant 0 : index
    %87 = vector.load %arg5[%c3, %c0_27] : memref<6x32xf32, #tpu.memory_space<vmem>>, vector<1x32xf32>
    %cst_28 = arith.constant dense<0.000000e+00> : vector<16xf32>
    %88 = vector.multi_reduction <add>, %85, %cst_28 [1] : vector<16x32xf32> to vector<16xf32>
    %89 = vector.shape_cast %88 : vector<16xf32> to vector<16x1xf32>
    %cst_29 = arith.constant 3.200000e+01 : f32
    %90 = vector.broadcast %cst_29 : f32 to vector<16x1xf32>
    %91 = arith.divf %89, %90 : vector<16x1xf32>
    %92 = vector.broadcast %91 : vector<16x1xf32> to vector<16x32xf32>
    %93 = arith.subf %85, %92 : vector<16x32xf32>
    %94 = arith.mulf %93, %93 : vector<16x32xf32>
    %cst_30 = arith.constant dense<0.000000e+00> : vector<16xf32>
    %95 = vector.multi_reduction <add>, %94, %cst_30 [1] : vector<16x32xf32> to vector<16xf32>
    %96 = vector.shape_cast %95 : vector<16xf32> to vector<16x1xf32>
    %cst_31 = arith.constant 3.200000e+01 : f32
    %97 = vector.broadcast %cst_31 : f32 to vector<16x1xf32>
    %98 = arith.divf %96, %97 : vector<16x1xf32>
    %99 = vector.broadcast %91 : vector<16x1xf32> to vector<16x32xf32>
    %100 = arith.subf %85, %99 : vector<16x32xf32>
    %cst_32 = arith.constant 9.99999974E-6 : f32
    %101 = vector.broadcast %cst_32 : f32 to vector<16x1xf32>
    %102 = arith.addf %98, %101 : vector<16x1xf32>
    %103 = math.rsqrt %102 : vector<16x1xf32>
    %104 = vector.broadcast %103 : vector<16x1xf32> to vector<16x32xf32>
    %105 = arith.mulf %100, %104 : vector<16x32xf32>
    %106 = vector.broadcast %86 : vector<1x32xf32> to vector<16x32xf32>
    %107 = arith.mulf %105, %106 : vector<16x32xf32>
    %108 = vector.broadcast %87 : vector<1x32xf32> to vector<16x32xf32>
    %109 = arith.addf %107, %108 : vector<16x32xf32>
    %c0_33 = arith.constant 0 : index
    %c0_34 = arith.constant 0 : index
    %110 = vector.load %arg3[%c0_33, %c0_34] : memref<16x16xf32, #tpu.memory_space<vmem>>, vector<16x16xf32>
    %c1 = arith.constant 1 : index
    %c0_35 = arith.constant 0 : index
    %c0_36 = arith.constant 0 : index
    %111 = vector.load %arg4[%c1, %c0_35, %c0_36] : memref<2x33x128xf32, #tpu.memory_space<vmem>>, vector<1x33x128xf32>
    %112 = vector.shape_cast %111 : vector<1x33x128xf32> to vector<33x128xf32>
    %113 = vector.extract_strided_slice %112 {offsets = [0, 0], sizes = [32, 128], strides = [1, 1]} : vector<33x128xf32> to vector<32x128xf32>
    %114 = vector.extract_strided_slice %112 {offsets = [32, 0], sizes = [1, 128], strides = [1, 1]} : vector<33x128xf32> to vector<1x128xf32>
    %115 = vector.extract_strided_slice %113 {offsets = [0, 0], sizes = [32, 32], strides = [1, 1]} : vector<32x128xf32> to vector<32x32xf32>
    %cst_37 = arith.constant dense<0.000000e+00> : vector<16x32xf32>
    %116 = tpu.matmul %109, %115, %cst_37 {dimension_numbers = #tpu.dot_dimension_numbers<[1], [0], [0], [1], [0, 0, 1, 1], [], []>} : vector<16x32xf32>, vector<32x32xf32>, vector<16x32xf32> -> vector<16x32xf32>
    %117 = vector.extract_strided_slice %114 {offsets = [0, 0], sizes = [1, 32], strides = [1, 1]} : vector<1x128xf32> to vector<1x32xf32>
    %118 = vector.broadcast %117 : vector<1x32xf32> to vector<16x32xf32>
    %119 = arith.addf %116, %118 : vector<16x32xf32>
    %120 = vector.extract_strided_slice %113 {offsets = [0, 32], sizes = [32, 64], strides = [1, 1]} : vector<32x128xf32> to vector<32x64xf32>
    %cst_38 = arith.constant dense<0.000000e+00> : vector<16x64xf32>
    %121 = tpu.matmul %1, %120, %cst_38 {dimension_numbers = #tpu.dot_dimension_numbers<[1], [0], [0], [1], [0, 0, 1, 1], [], []>} : vector<16x32xf32>, vector<32x64xf32>, vector<16x64xf32> -> vector<16x64xf32>
    %122 = vector.extract_strided_slice %114 {offsets = [0, 32], sizes = [1, 64], strides = [1, 1]} : vector<1x128xf32> to vector<1x64xf32>
    %123 = vector.broadcast %122 : vector<1x64xf32> to vector<16x64xf32>
    %124 = arith.addf %121, %123 : vector<16x64xf32>
    %125 = vector.extract_strided_slice %124 {offsets = [0, 0], sizes = [16, 32], strides = [1, 1]} : vector<16x64xf32> to vector<16x32xf32>
    %126 = vector.extract_strided_slice %124 {offsets = [0, 32], sizes = [16, 32], strides = [1, 1]} : vector<16x64xf32> to vector<16x32xf32>
    %127 = vector.extract_strided_slice %119 {offsets = [0, 0], sizes = [16, 8], strides = [1, 1]} : vector<16x32xf32> to vector<16x8xf32>
    %128 = vector.extract_strided_slice %125 {offsets = [0, 0], sizes = [16, 8], strides = [1, 1]} : vector<16x32xf32> to vector<16x8xf32>
    %129 = vector.extract_strided_slice %126 {offsets = [0, 0], sizes = [16, 8], strides = [1, 1]} : vector<16x32xf32> to vector<16x8xf32>
    %cst_39 = arith.constant dense<0.000000e+00> : vector<16x16xf32>
    %130 = tpu.matmul %127, %128, %cst_39 {dimension_numbers = #tpu.dot_dimension_numbers<[1], [1], [0], [0], [0, 0, 1, 0], [], []>} : vector<16x8xf32>, vector<16x8xf32>, vector<16x16xf32> -> vector<16x16xf32>
    %131 = arith.addf %130, %110 : vector<16x16xf32>
    %cst_40 = arith.constant dense<0xFF800000> : vector<16xf32>
    %132 = vector.multi_reduction <maximumf>, %131, %cst_40 [1] : vector<16x16xf32> to vector<16xf32>
    %133 = vector.shape_cast %132 : vector<16xf32> to vector<16x1xf32>
    %134 = vector.broadcast %133 : vector<16x1xf32> to vector<16x16xf32>
    %135 = arith.subf %131, %134 : vector<16x16xf32>
    %136 = math.exp %135 : vector<16x16xf32>
    %cst_41 = arith.constant dense<0.000000e+00> : vector<16xf32>
    %137 = vector.multi_reduction <add>, %136, %cst_41 [1] : vector<16x16xf32> to vector<16xf32>
    %138 = vector.shape_cast %137 : vector<16xf32> to vector<16x1xf32>
    %139 = tpu.reciprocal %138 {approx = true} : vector<16x1xf32> -> vector<16x1xf32>
    %140 = vector.broadcast %139 : vector<16x1xf32> to vector<16x16xf32>
    %141 = arith.mulf %136, %140 : vector<16x16xf32>
    %cst_42 = arith.constant dense<0.000000e+00> : vector<16x8xf32>
    %142 = tpu.matmul %141, %129, %cst_42 {dimension_numbers = #tpu.dot_dimension_numbers<[1], [0], [0], [1], [0, 0, 1, 1], [], []>} : vector<16x16xf32>, vector<16x8xf32>, vector<16x8xf32> -> vector<16x8xf32>
    %143 = vector.extract_strided_slice %119 {offsets = [0, 8], sizes = [16, 8], strides = [1, 1]} : vector<16x32xf32> to vector<16x8xf32>
    %144 = vector.extract_strided_slice %125 {offsets = [0, 8], sizes = [16, 8], strides = [1, 1]} : vector<16x32xf32> to vector<16x8xf32>
    %145 = vector.extract_strided_slice %126 {offsets = [0, 8], sizes = [16, 8], strides = [1, 1]} : vector<16x32xf32> to vector<16x8xf32>
    %cst_43 = arith.constant dense<0.000000e+00> : vector<16x16xf32>
    %146 = tpu.matmul %143, %144, %cst_43 {dimension_numbers = #tpu.dot_dimension_numbers<[1], [1], [0], [0], [0, 0, 1, 0], [], []>} : vector<16x8xf32>, vector<16x8xf32>, vector<16x16xf32> -> vector<16x16xf32>
    %147 = arith.addf %146, %110 : vector<16x16xf32>
    %cst_44 = arith.constant dense<0xFF800000> : vector<16xf32>
    %148 = vector.multi_reduction <maximumf>, %147, %cst_44 [1] : vector<16x16xf32> to vector<16xf32>
    %149 = vector.shape_cast %148 : vector<16xf32> to vector<16x1xf32>
    %150 = vector.broadcast %149 : vector<16x1xf32> to vector<16x16xf32>
    %151 = arith.subf %147, %150 : vector<16x16xf32>
    %152 = math.exp %151 : vector<16x16xf32>
    %cst_45 = arith.constant dense<0.000000e+00> : vector<16xf32>
    %153 = vector.multi_reduction <add>, %152, %cst_45 [1] : vector<16x16xf32> to vector<16xf32>
    %154 = vector.shape_cast %153 : vector<16xf32> to vector<16x1xf32>
    %155 = tpu.reciprocal %154 {approx = true} : vector<16x1xf32> -> vector<16x1xf32>
    %156 = vector.broadcast %155 : vector<16x1xf32> to vector<16x16xf32>
    %157 = arith.mulf %152, %156 : vector<16x16xf32>
    %cst_46 = arith.constant dense<0.000000e+00> : vector<16x8xf32>
    %158 = tpu.matmul %157, %145, %cst_46 {dimension_numbers = #tpu.dot_dimension_numbers<[1], [0], [0], [1], [0, 0, 1, 1], [], []>} : vector<16x16xf32>, vector<16x8xf32>, vector<16x8xf32> -> vector<16x8xf32>
    %159 = vector.extract_strided_slice %119 {offsets = [0, 16], sizes = [16, 8], strides = [1, 1]} : vector<16x32xf32> to vector<16x8xf32>
    %160 = vector.extract_strided_slice %125 {offsets = [0, 16], sizes = [16, 8], strides = [1, 1]} : vector<16x32xf32> to vector<16x8xf32>
    %161 = vector.extract_strided_slice %126 {offsets = [0, 16], sizes = [16, 8], strides = [1, 1]} : vector<16x32xf32> to vector<16x8xf32>
    %cst_47 = arith.constant dense<0.000000e+00> : vector<16x16xf32>
    %162 = tpu.matmul %159, %160, %cst_47 {dimension_numbers = #tpu.dot_dimension_numbers<[1], [1], [0], [0], [0, 0, 1, 0], [], []>} : vector<16x8xf32>, vector<16x8xf32>, vector<16x16xf32> -> vector<16x16xf32>
    %163 = arith.addf %162, %110 : vector<16x16xf32>
    %cst_48 = arith.constant dense<0xFF800000> : vector<16xf32>
    %164 = vector.multi_reduction <maximumf>, %163, %cst_48 [1] : vector<16x16xf32> to vector<16xf32>
    %165 = vector.shape_cast %164 : vector<16xf32> to vector<16x1xf32>
    %166 = vector.broadcast %165 : vector<16x1xf32> to vector<16x16xf32>
    %167 = arith.subf %163, %166 : vector<16x16xf32>
    %168 = math.exp %167 : vector<16x16xf32>
    %cst_49 = arith.constant dense<0.000000e+00> : vector<16xf32>
    %169 = vector.multi_reduction <add>, %168, %cst_49 [1] : vector<16x16xf32> to vector<16xf32>
    %170 = vector.shape_cast %169 : vector<16xf32> to vector<16x1xf32>
    %171 = tpu.reciprocal %170 {approx = true} : vector<16x1xf32> -> vector<16x1xf32>
    %172 = vector.broadcast %171 : vector<16x1xf32> to vector<16x16xf32>
    %173 = arith.mulf %168, %172 : vector<16x16xf32>
    %cst_50 = arith.constant dense<0.000000e+00> : vector<16x8xf32>
    %174 = tpu.matmul %173, %161, %cst_50 {dimension_numbers = #tpu.dot_dimension_numbers<[1], [0], [0], [1], [0, 0, 1, 1], [], []>} : vector<16x16xf32>, vector<16x8xf32>, vector<16x8xf32> -> vector<16x8xf32>
    %175 = vector.extract_strided_slice %119 {offsets = [0, 24], sizes = [16, 8], strides = [1, 1]} : vector<16x32xf32> to vector<16x8xf32>
    %176 = vector.extract_strided_slice %125 {offsets = [0, 24], sizes = [16, 8], strides = [1, 1]} : vector<16x32xf32> to vector<16x8xf32>
    %177 = vector.extract_strided_slice %126 {offsets = [0, 24], sizes = [16, 8], strides = [1, 1]} : vector<16x32xf32> to vector<16x8xf32>
    %cst_51 = arith.constant dense<0.000000e+00> : vector<16x16xf32>
    %178 = tpu.matmul %175, %176, %cst_51 {dimension_numbers = #tpu.dot_dimension_numbers<[1], [1], [0], [0], [0, 0, 1, 0], [], []>} : vector<16x8xf32>, vector<16x8xf32>, vector<16x16xf32> -> vector<16x16xf32>
    %179 = arith.addf %178, %110 : vector<16x16xf32>
    %cst_52 = arith.constant dense<0xFF800000> : vector<16xf32>
    %180 = vector.multi_reduction <maximumf>, %179, %cst_52 [1] : vector<16x16xf32> to vector<16xf32>
    %181 = vector.shape_cast %180 : vector<16xf32> to vector<16x1xf32>
    %182 = vector.broadcast %181 : vector<16x1xf32> to vector<16x16xf32>
    %183 = arith.subf %179, %182 : vector<16x16xf32>
    %184 = math.exp %183 : vector<16x16xf32>
    %cst_53 = arith.constant dense<0.000000e+00> : vector<16xf32>
    %185 = vector.multi_reduction <add>, %184, %cst_53 [1] : vector<16x16xf32> to vector<16xf32>
    %186 = vector.shape_cast %185 : vector<16xf32> to vector<16x1xf32>
    %187 = tpu.reciprocal %186 {approx = true} : vector<16x1xf32> -> vector<16x1xf32>
    %188 = vector.broadcast %187 : vector<16x1xf32> to vector<16x16xf32>
    %189 = arith.mulf %184, %188 : vector<16x16xf32>
    %cst_54 = arith.constant dense<0.000000e+00> : vector<16x8xf32>
    %190 = tpu.matmul %189, %177, %cst_54 {dimension_numbers = #tpu.dot_dimension_numbers<[1], [0], [0], [1], [0, 0, 1, 1], [], []>} : vector<16x16xf32>, vector<16x8xf32>, vector<16x8xf32> -> vector<16x8xf32>
    %191 = tpu.concatenate %142, %158, %174, %190 in 1 : vector<16x8xf32>, vector<16x8xf32>, vector<16x8xf32>, vector<16x8xf32> -> vector<16x32xf32>
    %192 = vector.extract_strided_slice %113 {offsets = [0, 96], sizes = [32, 32], strides = [1, 1]} : vector<32x128xf32> to vector<32x32xf32>
    %cst_55 = arith.constant dense<0.000000e+00> : vector<16x32xf32>
    %193 = tpu.matmul %191, %192, %cst_55 {dimension_numbers = #tpu.dot_dimension_numbers<[1], [0], [0], [1], [0, 0, 1, 1], [], []>} : vector<16x32xf32>, vector<32x32xf32>, vector<16x32xf32> -> vector<16x32xf32>
    %194 = vector.extract_strided_slice %114 {offsets = [0, 96], sizes = [1, 32], strides = [1, 1]} : vector<1x128xf32> to vector<1x32xf32>
    %195 = vector.broadcast %194 : vector<1x32xf32> to vector<16x32xf32>
    %196 = arith.addf %193, %195 : vector<16x32xf32>
    %197 = arith.addf %109, %196 : vector<16x32xf32>
    %c1_56 = arith.constant 1 : index
    %c0_57 = arith.constant 0 : index
    %198 = vector.load %arg5[%c1_56, %c0_57] : memref<6x32xf32, #tpu.memory_space<vmem>>, vector<1x32xf32>
    %c4 = arith.constant 4 : index
    %c0_58 = arith.constant 0 : index
    %199 = vector.load %arg5[%c4, %c0_58] : memref<6x32xf32, #tpu.memory_space<vmem>>, vector<1x32xf32>
    %cst_59 = arith.constant dense<0.000000e+00> : vector<16xf32>
    %200 = vector.multi_reduction <add>, %197, %cst_59 [1] : vector<16x32xf32> to vector<16xf32>
    %201 = vector.shape_cast %200 : vector<16xf32> to vector<16x1xf32>
    %cst_60 = arith.constant 3.200000e+01 : f32
    %202 = vector.broadcast %cst_60 : f32 to vector<16x1xf32>
    %203 = arith.divf %201, %202 : vector<16x1xf32>
    %204 = vector.broadcast %203 : vector<16x1xf32> to vector<16x32xf32>
    %205 = arith.subf %197, %204 : vector<16x32xf32>
    %206 = arith.mulf %205, %205 : vector<16x32xf32>
    %cst_61 = arith.constant dense<0.000000e+00> : vector<16xf32>
    %207 = vector.multi_reduction <add>, %206, %cst_61 [1] : vector<16x32xf32> to vector<16xf32>
    %208 = vector.shape_cast %207 : vector<16xf32> to vector<16x1xf32>
    %cst_62 = arith.constant 3.200000e+01 : f32
    %209 = vector.broadcast %cst_62 : f32 to vector<16x1xf32>
    %210 = arith.divf %208, %209 : vector<16x1xf32>
    %211 = vector.broadcast %203 : vector<16x1xf32> to vector<16x32xf32>
    %212 = arith.subf %197, %211 : vector<16x32xf32>
    %cst_63 = arith.constant 9.99999974E-6 : f32
    %213 = vector.broadcast %cst_63 : f32 to vector<16x1xf32>
    %214 = arith.addf %210, %213 : vector<16x1xf32>
    %215 = math.rsqrt %214 : vector<16x1xf32>
    %216 = vector.broadcast %215 : vector<16x1xf32> to vector<16x32xf32>
    %217 = arith.mulf %212, %216 : vector<16x32xf32>
    %218 = vector.broadcast %198 : vector<1x32xf32> to vector<16x32xf32>
    %219 = arith.mulf %217, %218 : vector<16x32xf32>
    %220 = vector.broadcast %199 : vector<1x32xf32> to vector<16x32xf32>
    %221 = arith.addf %219, %220 : vector<16x32xf32>
    %c0_64 = arith.constant 0 : index
    %c0_65 = arith.constant 0 : index
    %222 = vector.load %arg6[%c0_64, %c0_65] : memref<32x64xf32, #tpu.memory_space<vmem>>, vector<32x64xf32>
    %cst_66 = arith.constant dense<0.000000e+00> : vector<16x64xf32>
    %223 = tpu.matmul %221, %222, %cst_66 {dimension_numbers = #tpu.dot_dimension_numbers<[1], [0], [0], [1], [0, 0, 1, 1], [], []>} : vector<16x32xf32>, vector<32x64xf32>, vector<16x64xf32> -> vector<16x64xf32>
    %c0_67 = arith.constant 0 : index
    %c0_68 = arith.constant 0 : index
    %224 = vector.load %arg8[%c0_67, %c0_68] : memref<1x96xf32, #tpu.memory_space<vmem>>, vector<1x64xf32>
    %225 = vector.broadcast %224 : vector<1x64xf32> to vector<16x64xf32>
    %226 = arith.addf %223, %225 : vector<16x64xf32>
    %cst_69 = arith.constant 0.000000e+00 : f32
    %227 = vector.broadcast %cst_69 : f32 to vector<16x64xf32>
    %228 = arith.maximumf %226, %227 : vector<16x64xf32>
    %c0_70 = arith.constant 0 : index
    %c0_71 = arith.constant 0 : index
    %229 = vector.load %arg7[%c0_70, %c0_71] : memref<64x32xf32, #tpu.memory_space<vmem>>, vector<64x32xf32>
    %cst_72 = arith.constant dense<0.000000e+00> : vector<16x32xf32>
    %230 = tpu.matmul %228, %229, %cst_72 {dimension_numbers = #tpu.dot_dimension_numbers<[1], [0], [0], [1], [0, 0, 1, 1], [], []>} : vector<16x64xf32>, vector<64x32xf32>, vector<16x32xf32> -> vector<16x32xf32>
    %c0_73 = arith.constant 0 : index
    %c64 = arith.constant 64 : index
    %231 = vector.load %arg8[%c0_73, %c64] : memref<1x96xf32, #tpu.memory_space<vmem>>, vector<1x32xf32>
    %232 = vector.broadcast %231 : vector<1x32xf32> to vector<16x32xf32>
    %233 = arith.addf %230, %232 : vector<16x32xf32>
    %234 = arith.addf %221, %233 : vector<16x32xf32>
    %c2 = arith.constant 2 : index
    %c0_74 = arith.constant 0 : index
    %235 = vector.load %arg5[%c2, %c0_74] : memref<6x32xf32, #tpu.memory_space<vmem>>, vector<1x32xf32>
    %c5 = arith.constant 5 : index
    %c0_75 = arith.constant 0 : index
    %236 = vector.load %arg5[%c5, %c0_75] : memref<6x32xf32, #tpu.memory_space<vmem>>, vector<1x32xf32>
    %cst_76 = arith.constant dense<0.000000e+00> : vector<16xf32>
    %237 = vector.multi_reduction <add>, %234, %cst_76 [1] : vector<16x32xf32> to vector<16xf32>
    %238 = vector.shape_cast %237 : vector<16xf32> to vector<16x1xf32>
    %cst_77 = arith.constant 3.200000e+01 : f32
    %239 = vector.broadcast %cst_77 : f32 to vector<16x1xf32>
    %240 = arith.divf %238, %239 : vector<16x1xf32>
    %241 = vector.broadcast %240 : vector<16x1xf32> to vector<16x32xf32>
    %242 = arith.subf %234, %241 : vector<16x32xf32>
    %243 = arith.mulf %242, %242 : vector<16x32xf32>
    %cst_78 = arith.constant dense<0.000000e+00> : vector<16xf32>
    %244 = vector.multi_reduction <add>, %243, %cst_78 [1] : vector<16x32xf32> to vector<16xf32>
    %245 = vector.shape_cast %244 : vector<16xf32> to vector<16x1xf32>
    %cst_79 = arith.constant 3.200000e+01 : f32
    %246 = vector.broadcast %cst_79 : f32 to vector<16x1xf32>
    %247 = arith.divf %245, %246 : vector<16x1xf32>
    %248 = vector.broadcast %240 : vector<16x1xf32> to vector<16x32xf32>
    %249 = arith.subf %234, %248 : vector<16x32xf32>
    %cst_80 = arith.constant 9.99999974E-6 : f32
    %250 = vector.broadcast %cst_80 : f32 to vector<16x1xf32>
    %251 = arith.addf %247, %250 : vector<16x1xf32>
    %252 = math.rsqrt %251 : vector<16x1xf32>
    %253 = vector.broadcast %252 : vector<16x1xf32> to vector<16x32xf32>
    %254 = arith.mulf %249, %253 : vector<16x32xf32>
    %255 = vector.broadcast %235 : vector<1x32xf32> to vector<16x32xf32>
    %256 = arith.mulf %254, %255 : vector<16x32xf32>
    %257 = vector.broadcast %236 : vector<1x32xf32> to vector<16x32xf32>
    %258 = arith.addf %256, %257 : vector<16x32xf32>
    %c0_81 = arith.constant 0 : index
    %c0_82 = arith.constant 0 : index
    %259 = vector.load %arg9[%c0_81, %c0_82] : memref<16x32xf32, #tpu.memory_space<vmem>>, vector<16x32xf32>
    tpu.vector_store %arg9[%c0_81, %c0_82], %258 {strides = array<i32>} : memref<16x32xf32, #tpu.memory_space<vmem>>, vector<16x32xf32>,
    return
  }
}

</mosaic_0001>

<bundles_post_ra>
// kernel: decoder_layer.1
= control target key start
LH: loop header
LB: loop body
LE: loop exit
PB: predicated region body
PF: predicated region fallthrough
CT: control target
= control target key end

     0   :  { %vm48_vm0 = vcmask 261120   ;;  %s3783_s0 = inlined_call_operand.vmem [shape: f32[16,32], index: 0, kind: input, shape index: {}]   ;;  %s3784_s1 = inlined_call_operand.vmem [shape: f32[16,32], index: 1, kind: input, shape index: {}]   ;;  %s3785_s2 = inlined_call_operand.vmem [shape: f32[16,16], index: 2, kind: input, shape index: {}]   ;;  %s3786_s3 = inlined_call_operand.vmem [shape: f32[16,16], index: 3, kind: input, shape index: {}]   ;;  %s3787_s4 = inlined_call_operand.vmem [shape: f32[2,33,128], index: 4, kind: input, shape index: {}]   ;;  %s3788_s5 = inlined_call_operand.vmem [shape: f32[6,32], index: 5, kind: input, shape index: {}]   ;;  %s3789_s6 = inlined_call_operand.vmem [shape: f32[32,64], index: 6, kind: input, shape index: {}]   ;;  %s3790_s7 = inlined_call_operand.vmem [shape: f32[64,32], index: 7, kind: input, shape index: {}]   ;;  %s3791_s8 = inlined_call_operand.vmem [shape: f32[1,96], index: 8, kind: input, shape index: {}]   ;;  %s3792_s9 = inlined_call_operand.hbm [shape: f32[16,32], index: 9, kind: output, shape index: {}]  }
   0x1   :  { %v3329_v0 = vld [vmem:[%s3787_s4] sm:$0xff]  ;;  %v3334_v1 = vld [vmem:[%s3787_s4 + $0x8] sm:$0xff]  ;;  %v3339_v2 = vld [vmem:[%s3787_s4 + $0x10] sm:$0xff] }
   0x2   :  { %v3094_v3 = vpack.i.bf16 %v3334_v1, %v3329_v0  ;;  %v2893_v4 = vpack.c.bf16 %v3334_v1, %v3329_v0  ;;  %v3348_v5 = vld [vmem:[%s3787_s4 + $0x18] sm:$0xff]  ;;  %v3353_v6 = vld [vmem:[%s3783_s0] sm:$0xff] }
   0x3   :  { %v2897_v7 = vpack.c.bf16 %v3348_v5, %v3339_v2  ;;  %2704 = vmatprep.mubr.msk.f32.mxu1 %vm48_vm0, %v3353_v6 }
   0x4   :  { %14 = vsyncpa [#allocation3], 0  ;;  %2894 = vmatprep.subr.bf16.mxu1 %v2893_v4  ;;  %v3362_v8 = vld [vmem:[%s3783_s0 + $0x8] sm:$0xff]  ;;  %v3369_v9 = vld [vmem:[%s3787_s4 + $0x20] ss:$0 sm:$0xff]  ;;  %vm136_vm1 = vcmask 64512  }
   0x5   :  { %2896 = vmatpush3.bf16.msra.mxu1 %v2893_v4  ;;  %s3259_s23 = smov 120   ;;  %s3260_s0 = smov 96   ;;  %vm3393_vm2 = vmpackc.low %vm136_vm1, %vm136_vm1  ;;  %v3412_v26 = vld [vmem:[%s3785_s2 + $0x8] sm:$0xff]  ;;  %v3417_v27 = vld [vmem:[%s3785_s2] sm:$0xff]  ;;  %vm220_vm3 = vcmask 130048   ;;  %vm958_vm4 = vcmask 195584  }
   0x6   :  { %2898 = vmatprep.subr.bf16.mxu1 %v2897_v7  ;;  %s3261_s24 = smov 88   ;;  %s3262_s2 = smov 64   ;;  %vm2368_vm5 = vcmask 523264  }
   0x7   :  { %s3263_s29 = smov 80   ;;  %s3264_s30 = smov 56  }
   0x8   :  { %s3265_s10 = smov 112   ;;  %s3266_s11 = smov 72  }
   0x9   :  { %2900 = vmatpush3.bf16.msra.mxu1 %v2897_v7  ;;  %s3267_s12 = smov 104   ;;  %s3268_s13 = smov 48  }
   0xa   :  { %s3269_s14 = smov 32   ;;  %s3270_s15 = smov 40  }
   0xb   :  { %s3271_s16 = smov 8   ;;  %s3272_s17 = smov 16  }
   0xc   :  { %2705 = vmatmul.mubr.msk.f32.vlgmr.msra.gmra.mrb[0].mxu1 %vm48_vm0, %v3362_v8  ;;  %s3273_s18 = smov 24  }
  0xdf   :  { %v2706_v10 = vpop.f32.mrb[0].mxu1 }
  0xe0   :  { %v3372_v11 = vadd.f32 %v2706_v10, %v3369_v9  ;;  %v121_v12 = vpop.f32.mrb[1].mxu1 }
  0xe1   :  { %v3375_v13 = vadd.f32 %v3369_v9, %v121_v12 }
  0xe3   :  { %330 = vrot.lane.b32.xlu1 %v3375_v13, %s3259_s23  ;;  %2711 = vmatprep.mubr.msk.f32.mxu1 %vm136_vm1, %v3375_v13  ;;  %v3383_v14 = vpack.i.bf16 %v3372_v11, %v3375_v13 }
  0xe5   :  { %3055 = vrot.lane.b32.xlu0 %v3383_v14, %s3260_s0 }
  0xe7   :  { %332 = vrot.lane.b32.xlu1 %v3372_v11, %s3259_s23 }
  0xe9   :  { %3060 = vrot.lane.b32.xlu0 %v3383_v14, %s3261_s24 }
 0x155   :  { %v331_v24 = vpop.permute.xlu1 %330 }
 0x157   :  { %v3056_v15 = vpop.permute.xlu0 %3055 }
 0x158   :  { %v3058_v16 = vunpack.i.h.bf16 %v3056_v15  ;;  %v3057_v17 = vunpack.i.l.bf16 %v3056_v15 }
 0x159   :  { %v333_v25 = vpop.permute.xlu1 %332 }
 0x15a   :  { %v2901_v19 = vpack.c.bf16 %v3058_v16, %v3057_v17 }
 0x15b   :  { %v3061_v20 = vpop.permute.xlu0 %3060 }
 0x15c   :  { %v3063_v21 = vunpack.i.h.bf16 %v3061_v20  ;;  %v3062_v22 = vunpack.i.l.bf16 %v3061_v20  ;;  %2903 = vmatprep.subr.msk.bf16.mxu1 %vm3393_vm2, %v2901_v19 }
 0x15d   :  { %2906 = vmatpush3.bf16.xpose.msk.msra.mxu1 %vm3393_vm2, %v2901_v19 }
 0x15e   :  { %v2911_v23 = vpack.c.bf16 %v3063_v21, %v3062_v22 }
 0x160   :  { %2913 = vmatprep.subr.msk.bf16.mxu1 %vm3393_vm2, %v2911_v23 }
 0x164   :  { %2712 = vmatmul.mubr.msk.f32.vlgmr.msra.gmra.mrb[2].mxu1 %vm136_vm1, %v3372_v11 }
 0x165   :  { %2916 = vmatpush3.bf16.xpose.msk.msra.mxu1 %vm3393_vm2, %v2911_v23  ;;  %2725 = vmatprep.mubr.msk.f32.mxu1 %vm136_vm1, %v331_v24 }
 0x16c   :  { %2726 = vmatmul.mubr.msk.f32.vlgmr.msra.gmra.mrb[4].mxu1 %vm136_vm1, %v333_v25 }
 0x237   :  { %v2713_v28 = vpop.f32.mrb[2].mxu1 }
 0x238   :  { %v217_v29 = vadd.f32 %v2713_v28, %v3412_v26  ;;  %v211_v30 = vpop.f32.mrb[3].mxu1 }
 0x239   :  { %v212_v31 = vadd.f32 %v211_v30, %v3417_v27 }
 0x23a   :  { %v224_v32 = vsel %vm220_vm3, %v217_v29, -inf }
 0x23b   :  { %225 = vmax.xlane.f32.xlu1 %v224_v32  ;;  %v221_v33 = vsel %vm220_vm3, %v212_v31, -inf }
 0x23c   :  { %222 = vmax.xlane.f32.xlu0 %v221_v33 }
 0x23f   :  { %v2727_v34 = vpop.f32.mrb[4].mxu1 }
 0x240   :  { %v412_v35 = vpop.f32.mrb[5].mxu1  ;;  %v418_v37 = vadd.f32 %v2727_v34, %v3412_v26 }
 0x241   :  { %v413_v36 = vadd.f32 %v412_v35, %v3417_v27 }
 0x242   :  { %v424_v39 = vsel %vm220_vm3, %v418_v37, -inf }
 0x243   :  { %v421_v38 = vsel %vm220_vm3, %v413_v36, -inf }
 0x244   :  { %422 = vmax.xlane.f32.xlu0 %v421_v38 }
 0x248   :  { %425 = vmax.xlane.f32.xlu0 %v424_v39 }
 0x24c   :  { %3065 = vrot.lane.b32.xlu1 %v3383_v14, %s3262_s2 }
 0x2c8   :  { %v226_v40 = vpop.xlane.xlu1 %225 }
 0x2c9   :  { %v228_v41 = vsub.f32 %v217_v29, %v226_v40  ;;  %v223_v42 = vpop.xlane.xlu0 %222 }
 0x2ca   :  { %v227_v43 = vsub.f32 %v212_v31, %v223_v42 }
 0x2cb   :  { %v231_v44 = vmul.f32 1.442695, %v228_v41 }
 0x2cc   :  { %v229_v45 = vmul.f32 1.442695, %v227_v43  ;;  %v3066_v46 = vpop.permute.xlu1 %3065 }
 0x2cd   :  { %3159 = vpow2.f32 %v231_v44  ;;  %v3068_v47 = vunpack.i.h.bf16 %v3066_v46  ;;  %v3067_v48 = vunpack.i.l.bf16 %v3066_v46 }
 0x2ce   :  { %3161 = vpow2.f32 %v229_v45 }
 0x2cf   :  { %v2907_v49 = vpack.c.bf16 %v3068_v47, %v3067_v48 }
 0x2d1   :  { %2908 = vmatprep.subr.bf16.mxu0 %v2907_v49  ;;  %v423_v50 = vpop.xlane.xlu0 %422 }
 0x2d2   :  { %2910 = vmatpush3.bf16.msra.mxu0 %v2907_v49  ;;  %v427_v60 = vsub.f32 %v413_v36, %v423_v50 }
 0x2d4   :  { %v429_v61 = vmul.f32 1.442695, %v427_v60 }
 0x2d5   :  { %v426_v51 = vpop.xlane.xlu0 %425 }
 0x2d6   :  { %v428_v52 = vsub.f32 %v418_v37, %v426_v51 }
 0x2d7   :  { %v3160_v53 = vpop.eup %3159 }
 0x2d8   :  { %v3162_v54 = vpop.eup %3161  ;;  %v431_v55 = vmul.f32 1.442695, %v428_v52  ;;  %v236_v56 = vsel %vm220_vm3, %v3160_v53, 0.0 }
 0x2d9   :  { %237 = vadd.xlane.f32.xlu0 %v236_v56  ;;  %v233_v57 = vsel %vm220_vm3, %v3162_v54, 0.0 }
 0x2da   :  { %3163 = vpow2.f32 %v431_v55  ;;  %234 = vadd.xlane.f32.xlu1 %v233_v57 }
 0x2db   :  { %3165 = vpow2.f32 %v429_v61 }
 0x2e4   :  { %v3164_v58 = vpop.eup %3163 }
 0x2e5   :  { %v436_v59 = vsel %vm220_vm3, %v3164_v58, 0.0  ;;  %v3166_v62 = vpop.eup %3165 }
 0x2e6   :  { %437 = vadd.xlane.f32.xlu0 %v436_v59  ;;  %v433_v63 = vsel %vm220_vm3, %v3166_v62, 0.0 }
 0x2eb   :  { %3075 = vrot.lane.b32.xlu1 %v3383_v14, %s3263_s29 }
 0x2fc   :  { %3070 = vrot.lane.b32.xlu0 %v3383_v14, %s3264_s30 }
 0x300   :  { %532 = vrot.lane.b32.xlu0 %v3372_v11, %s3265_s10 }
 0x30f   :  { %434 = vadd.xlane.f32.xlu1 %v433_v63 }
 0x320   :  { %530 = vrot.lane.b32.xlu1 %v3375_v13, %s3265_s10 }
 0x366   :  { %v238_v4 = vpop.xlane.xlu0 %237 }
 0x367   :  { %3167 = vrcp.f32 %v238_v4  ;;  %v235_v7 = vpop.xlane.xlu1 %234 }
 0x368   :  { %3169 = vrcp.f32 %v235_v7 }
 0x36b   :  { %v3076_v19 = vpop.permute.xlu1 %3075 }
 0x36c   :  { %v3078_v21 = vunpack.i.h.bf16 %v3076_v19  ;;  %v3077_v22 = vunpack.i.l.bf16 %v3076_v19 }
 0x36e   :  { %v2921_v28 = vpack.c.bf16 %v3078_v21, %v3077_v22 }
 0x371   :  { %v3168_v10 = vpop.eup %3167 }
 0x372   :  { %v3170_v12 = vpop.eup %3169  ;;  %v242_v17 = vmul.f32 %v3168_v10, %v3160_v53 }
 0x373   :  { %v438_v15 = vpop.xlane.xlu0 %437  ;;  %v241_v16 = vmul.f32 %v3170_v12, %v3162_v54 }
 0x374   :  { %3171 = vrcp.f32 %v438_v15 }
 0x375   :  { %2718 = vmatprep.mubr.msk.f32.mxu0 %vm220_vm3, %v241_v16 }
 0x376   :  { %2719 = vmatmul.mubr.msk.f32.vlgmr.msra.gmra.mrb[0].mxu0 %vm220_vm3, %v242_v17 }
 0x377   :  { %v3071_v20 = vpop.permute.xlu0 %3070 }
 0x378   :  { %v3073_v23 = vunpack.i.h.bf16 %v3071_v20  ;;  %v3072_v24 = vunpack.i.l.bf16 %v3071_v20 }
 0x37a   :  { %v2917_v25 = vpack.c.bf16 %v3073_v23, %v3072_v24 }
 0x37b   :  { %v533_v35 = vpop.permute.xlu0 %532 }
 0x37c   :  { %2918 = vmatprep.subr.bf16.mxu0 %v2917_v25 }
 0x37d   :  { %2920 = vmatpush3.bf16.msra.mxu0 %v2917_v25 }
 0x37e   :  { %2923 = vmatprep.subr.msk.bf16.mxu0 %vm3393_vm2, %v2921_v28  ;;  %v3172_v30 = vpop.eup %3171 }
 0x37f   :  { %v442_v33 = vmul.f32 %v3172_v30, %v3164_v58 }
 0x39c   :  { %v435_v29 = vpop.xlane.xlu1 %434 }
 0x39d   :  { %3173 = vrcp.f32 %v435_v29 }
 0x3a0   :  { %v531_v34 = vpop.permute.xlu1 %530 }
 0x3a7   :  { %v3174_v31 = vpop.eup %3173 }
 0x3a8   :  { %v441_v32 = vmul.f32 %v3174_v31, %v3166_v62 }
 0x3aa   :  { %2732 = vmatprep.mubr.msk.f32.mxu0 %vm220_vm3, %v441_v32 }
 0x3ab   :  { %2733 = vmatmul.mubr.msk.f32.vlgmr.msra.gmra.mrb[2].mxu0 %vm220_vm3, %v442_v33 }
 0x3ac   :  { %2926 = vmatpush3.bf16.xpose.msk.msra.mxu0 %vm3393_vm2, %v2921_v28  ;;  %2739 = vmatprep.mubr.msk.f32.mxu0 %vm136_vm1, %v531_v34 }
 0x3b3   :  { %2740 = vmatmul.mubr.msk.f32.vlgmr.msra.gmra.mrb[4].mxu0 %vm136_vm1, %v533_v35 }
 0x449   :  { %v3450_v36 = vpop.f32.mrb[0].mxu0 }
 0x44a   :  { %v3452_v37 = vpop.f32.mrb[1].mxu0 }
 0x47e   :  { %v3454_v38 = vpop.f32.mrb[2].mxu0 }
 0x47f   :  { %v3456_v39 = vpop.f32.mrb[3].mxu0 }
 0x486   :  { %v2741_v40 = vpop.f32.mrb[4].mxu0 }
 0x487   :  { %v618_v41 = vadd.f32 %v2741_v40, %v3412_v26  ;;  %v612_v42 = vpop.f32.mrb[5].mxu0  ;;  %v3099_v40 = vpack.i.bf16 %v3348_v5, %v3339_v2 }
 0x488   :  { %v613_v43 = vadd.f32 %v612_v42, %v3417_v27 }
 0x489   :  { %v624_v44 = vsel %vm220_vm3, %v618_v41, -inf }
 0x48a   :  { %625 = vmax.xlane.f32.xlu0 %v624_v44  ;;  %v621_v45 = vsel %vm220_vm3, %v613_v43, -inf }
 0x48b   :  { %622 = vmax.xlane.f32.xlu1 %v621_v45 }
 0x517   :  { %v626_v46 = vpop.xlane.xlu0 %625 }
 0x518   :  { %v628_v47 = vsub.f32 %v618_v41, %v626_v46  ;;  %v623_v48 = vpop.xlane.xlu1 %622 }
 0x519   :  { %v627_v49 = vsub.f32 %v613_v43, %v623_v48 }
 0x51a   :  { %v631_v50 = vmul.f32 1.442695, %v628_v47 }
 0x51b   :  { %v629_v51 = vmul.f32 1.442695, %v627_v49 }
 0x51c   :  { %3175 = vpow2.f32 %v631_v50 }
 0x51d   :  { %3177 = vpow2.f32 %v629_v51 }
 0x526   :  { %v3176_v52 = vpop.eup %3175 }
 0x527   :  { %v3178_v53 = vpop.eup %3177  ;;  %v636_v54 = vsel %vm220_vm3, %v3176_v52, 0.0 }
 0x528   :  { %637 = vadd.xlane.f32.xlu1 %v636_v54  ;;  %v633_v55 = vsel %vm220_vm3, %v3178_v53, 0.0 }
 0x529   :  { %634 = vadd.xlane.f32.xlu0 %v633_v55 }
 0x539   :  { %3085 = vrot.lane.b32.xlu1 %v3383_v14, %s3266_s11 }
 0x53d   :  { %730 = vrot.lane.b32.xlu1 %v3375_v13, %s3267_s12 }
 0x53f   :  { %3080 = vrot.lane.b32.xlu0 %v3383_v14, %s3268_s13 }
 0x543   :  { %732 = vrot.lane.b32.xlu0 %v3372_v11, %s3267_s12 }
 0x5b5   :  { %v638_v56 = vpop.xlane.xlu1 %637 }
 0x5b6   :  { %3179 = vrcp.f32 %v638_v56  ;;  %v635_v57 = vpop.xlane.xlu0 %634 }
 0x5b7   :  { %3181 = vrcp.f32 %v635_v57 }
 0x5b9   :  { %v3086_v58 = vpop.permute.xlu1 %3085 }
 0x5ba   :  { %v3081_v59 = vpop.permute.xlu0 %3080  ;;  %v3088_v60 = vunpack.i.h.bf16 %v3086_v58  ;;  %v3087_v61 = vunpack.i.l.bf16 %v3086_v58 }
 0x5bb   :  { %v3083_v62 = vunpack.i.h.bf16 %v3081_v59  ;;  %v3082_v63 = vunpack.i.l.bf16 %v3081_v59 }
 0x5bc   :  { %v2931_v7 = vpack.c.bf16 %v3088_v60, %v3087_v61 }
 0x5bd   :  { %v2927_v4 = vpack.c.bf16 %v3083_v62, %v3082_v63  ;;  %v731_v15 = vpop.permute.xlu1 %730 }
 0x5be   :  { %v733_v16 = vpop.permute.xlu0 %732 }
 0x5bf   :  { %2928 = vmatprep.subr.bf16.mxu1 %v2927_v4 }
 0x5c0   :  { %v3180_v13 = vpop.eup %3179  ;;  %2930 = vmatpush3.bf16.msra.mxu1 %v2927_v4 }
 0x5c1   :  { %v3182_v10 = vpop.eup %3181  ;;  %2933 = vmatprep.subr.msk.bf16.mxu1 %vm3393_vm2, %v2931_v7  ;;  %v642_v12 = vmul.f32 %v3180_v13, %v3176_v52 }
 0x5c2   :  { %v641_v11 = vmul.f32 %v3182_v10, %v3178_v53 }
 0x5c4   :  { %2746 = vmatprep.mubr.msk.f32.mxu1 %vm220_vm3, %v641_v11 }
 0x5c5   :  { %2747 = vmatmul.mubr.msk.f32.vlgmr.msra.gmra.mrb[6].mxu1 %vm220_vm3, %v642_v12 }
 0x5c6   :  { %2753 = vmatprep.mubr.msk.f32.mxu1 %vm136_vm1, %v731_v15 }
 0x5c9   :  { %2936 = vmatpush3.bf16.xpose.msk.msra.mxu1 %vm3393_vm2, %v2931_v7 }
 0x5d0   :  { %2754 = vmatmul.mubr.msk.f32.vlgmr.msra.gmra.mrb[8].mxu1 %vm136_vm1, %v733_v16 }
 0x698   :  { %v2748_v17 = vpop.f32.mrb[6].mxu1 }
 0x699   :  { %v721_v19 = vpop.f32.mrb[7].mxu1 }
 0x6a3   :  { %v2755_v20 = vpop.f32.mrb[8].mxu1 }
 0x6a4   :  { %v818_v21 = vadd.f32 %v2755_v20, %v3412_v26  ;;  %v812_v22 = vpop.f32.mrb[9].mxu1 }
 0x6a5   :  { %v813_v23 = vadd.f32 %v812_v22, %v3417_v27 }
 0x6a6   :  { %v824_v24 = vsel %vm220_vm3, %v818_v21, -inf }
 0x6a7   :  { %825 = vmax.xlane.f32.xlu0 %v824_v24  ;;  %v821_v25 = vsel %vm220_vm3, %v813_v23, -inf }
 0x6a8   :  { %822 = vmax.xlane.f32.xlu1 %v821_v25 }
 0x734   :  { %v826_v28 = vpop.xlane.xlu0 %825 }
 0x735   :  { %v828_v29 = vsub.f32 %v818_v21, %v826_v28  ;;  %v823_v30 = vpop.xlane.xlu1 %822  ;;  %v2544_v28 = vld [vmem:[%s3787_s4 + $0x40] sm:$0xff] }
 0x736   :  { %v827_v31 = vsub.f32 %v813_v23, %v823_v30  ;;  %v2541_v30 = vld [vmem:[%s3787_s4 + $0x28] sm:$0xff] }
 0x737   :  { %v831_v32 = vmul.f32 1.442695, %v828_v29 }
 0x738   :  { %v829_v33 = vmul.f32 1.442695, %v827_v31  ;;  %v2542_v31 = vld [vmem:[%s3787_s4 + $0x30] sm:$0xff] }
 0x739   :  { %3183 = vpow2.f32 %v831_v32  ;;  %v3537_v32 = vpack.i.bf16 %v2542_v31, %v2541_v30 }
 0x73a   :  { %3185 = vpow2.f32 %v829_v33  ;;  %v2949_v33 = vpack.c.bf16 %v2542_v31, %v2541_v30 }
 0x73c   :  { %2950 = vmatprep.subr.bf16.mxu1 %v2949_v33 }
 0x73d   :  { %2952 = vmatpush3.bf16.msra.mxu1 %v2949_v33 }
 0x743   :  { %v3184_v34 = vpop.eup %3183 }
 0x744   :  { %v3186_v35 = vpop.eup %3185  ;;  %v836_v26 = vsel %vm220_vm3, %v3184_v34, 0.0 }
 0x745   :  { %837 = vadd.xlane.f32.xlu1 %v836_v26  ;;  %v833_v27 = vsel %vm220_vm3, %v3186_v35, 0.0  ;;  %v3548_v26 = vld [vmem:[%s3787_s4 + $0x48] ss:$0 sm:$0xff] }
 0x746   :  { %834 = vadd.xlane.f32.xlu0 %v833_v27 }
 0x756   :  { %3095 = vrot.lane.b32.xlu1 %v3094_v3, %s3269_s14 }
 0x75a   :  { %3100 = vrot.lane.b32.xlu1 %v3099_v40, %s3269_s14 }
 0x75c   :  { %3090 = vrot.lane.b32.xlu0 %v3383_v14, %s3270_s15 }
 0x75e   :  { %934 = vrot.lane.b32.xlu1 %v3454_v38, %s3271_s16 }
 0x760   :  { %932 = vrot.lane.b32.xlu0 %v3456_v39, %s3271_s16 }
 0x762   :  { %942 = vrot.lane.b32.xlu1 %v2748_v17, %s3272_s17 }
 0x764   :  { %940 = vrot.lane.b32.xlu0 %v721_v19, %s3272_s17 }
 0x7d2   :  { %v838_v0 = vpop.xlane.xlu1 %837 }
 0x7d3   :  { %3187 = vrcp.f32 %v838_v0  ;;  %v835_v1 = vpop.xlane.xlu0 %834 }
 0x7d4   :  { %3189 = vrcp.f32 %v835_v1 }
 0x7d6   :  { %v3096_v2 = vpop.permute.xlu1 %3095 }
 0x7d7   :  { %v3098_v3 = vunpack.i.h.bf16 %v3096_v2  ;;  %v3097_v5 = vunpack.i.l.bf16 %v3096_v2  ;;  %v3091_v14 = vpop.permute.xlu0 %3090 }
 0x7d8   :  { %v3093_v41 = vunpack.i.h.bf16 %v3091_v14  ;;  %v3092_v42 = vunpack.i.l.bf16 %v3091_v14 }
 0x7d9   :  { %v2941_v43 = vpack.c.bf16 %v3098_v3, %v3097_v5 }
 0x7da   :  { %v2937_v38 = vpack.c.bf16 %v3093_v41, %v3092_v42  ;;  %v3101_v44 = vpop.permute.xlu1 %3100 }
 0x7db   :  { %v3103_v45 = vunpack.i.h.bf16 %v3101_v44  ;;  %v3102_v39 = vunpack.i.l.bf16 %v3101_v44  ;;  %v933_v54 = vpop.permute.xlu0 %932 }
 0x7dc   :  { %2938 = vmatprep.subr.bf16.mxu0 %v2937_v38  ;;  %v954_v57 = vsel %vm136_vm1, %v3452_v37, %v933_v54 }
 0x7dd   :  { %v3188_v46 = vpop.eup %3187  ;;  %2940 = vmatpush3.bf16.msra.mxu0 %v2937_v38  ;;  %v2945_v50 = vpack.c.bf16 %v3103_v45, %v3102_v39 }
 0x7de   :  { %v3190_v47 = vpop.eup %3189  ;;  %2942 = vmatprep.subr.bf16.mxu0 %v2941_v43  ;;  %v842_v49 = vmul.f32 %v3188_v46, %v3184_v34  ;;  %v935_v53 = vpop.permute.xlu1 %934  ;;  %v35_v34 = vld [vmem:[%s3784_s1] sm:$0xff]  ;;  %v36_v46 = vld [vmem:[%s3784_s1 + $0x8] sm:$0xff] }
 0x7df   :  { %v841_v48 = vmul.f32 %v3190_v47, %v3186_v35  ;;  %v941_v56 = vpop.permute.xlu0 %940  ;;  %v955_v59 = vsel %vm136_vm1, %v3450_v36, %v935_v53  ;;  %v2539_v47 = vld [vmem:[%s3788_s5] ss:$0 sm:$0xff] }
 0x7e0   :  { %v956_v60 = vsel %vm220_vm3, %v954_v57, %v941_v56 }
 0x7e1   :  { %2760 = vmatprep.mubr.msk.f32.mxu0 %vm220_vm3, %v841_v48 }
 0x7e2   :  { %2761 = vmatmul.mubr.msk.f32.vlgmr.msra.gmra.mrb[6].mxu0 %vm220_vm3, %v842_v49  ;;  %v943_v55 = vpop.permute.xlu1 %942 }
 0x7e3   :  { %2944 = vmatpush3.bf16.msra.mxu0 %v2941_v43  ;;  %v957_v62 = vsel %vm220_vm3, %v955_v59, %v943_v55 }
 0x7e4   :  { %2946 = vmatprep.subr.bf16.mxu0 %v2945_v50 }
 0x7e7   :  { %2948 = vmatpush3.bf16.msra.mxu0 %v2945_v50 }
 0x8b5   :  { %v2762_v51 = vpop.f32.mrb[6].mxu0 }
 0x8b6   :  { %950 = vrot.lane.b32.xlu1 %v2762_v51, %s3273_s18  ;;  %v921_v52 = vpop.f32.mrb[7].mxu0  ;;  %v2540_v51 = vld [vmem:[%s3788_s5 + $0x3] ss:$0 sm:$0xff] }
 0x8b7   :  { %948 = vrot.lane.b32.xlu0 %v921_v52, %s3273_s18 }
 0x8bb   :  { %978 = vrot.lane.b32.xlu0 %v3369_v9, %s3269_s14 }
 0x928   :  { %v951_v58 = vpop.permute.xlu1 %950 }
 0x929   :  { %v949_v61 = vpop.permute.xlu0 %948  ;;  %v960_v9 = vsel %vm958_vm4, %v957_v62, %v951_v58 }
 0x92a   :  { %v959_v63 = vsel %vm958_vm4, %v956_v60, %v949_v61 }
 0x92b   :  { %2771 = vmatprep.mubr.msk.f32.mxu0 %vm48_vm0, %v959_v63 }
 0x92c   :  { %2772 = vmatmul.mubr.msk.f32.vlgmr.msra.gmra.mrb[8].mxu0 %vm48_vm0, %v960_v9 }
 0x92d   :  { %v979_v4 = vpop.permute.xlu0 %978  ;;  %2793 = vmatprep.mubr.msk.f32.mxu0 %vm48_vm0, %v35_v34 }
 0x9ff   :  { %v2773_v7 = vpop.f32.mrb[8].mxu0 }
 0xa00   :  { %v1059_v37 = vadd.f32 %v2773_v7, %v979_v4  ;;  %v1053_v13 = vpop.f32.mrb[9].mxu0 }
 0xa01   :  { %v1054_v10 = vadd.f32 %v1053_v13, %v979_v4 }
 0xa02   :  { %v1063_v36 = vadd.f32 %v1059_v37, %v3362_v8 }
 0xa03   :  { %v1062_v11 = vadd.f32 %v1054_v10, %v3353_v6  ;;  %v2543_v6 = vld [vmem:[%s3787_s4 + $0x38] sm:$0xff] }
 0xa04   :  { %v1069_v12 = vsel %vm48_vm0, %v1063_v36, 0.0  ;;  %v3527_v29 = vpack.i.bf16 %v2544_v28, %v2543_v6  ;;  %v2953_v35 = vpack.c.bf16 %v2544_v28, %v2543_v6 }
 0xa05   :  { %1070 = vadd.xlane.f32.xlu0 %v1069_v12  ;;  %v1066_v15 = vsel %vm48_vm0, %v1062_v11, 0.0 }
 0xa06   :  { %1067 = vadd.xlane.f32.xlu1 %v1066_v15  ;;  %2954 = vmatprep.subr.bf16.mxu1 %v2953_v35  ;;  %v3601_v15 = vld [vmem:[%s3786_s3 + $0x8] sm:$0xff] }
 0xa07   :  { %2956 = vmatpush3.bf16.msra.mxu1 %v2953_v35 }
 0xa92   :  { %v1071_v16 = vpop.xlane.xlu0 %1070 }
 0xa93   :  { %v1074_v17 = vmul.f32 0.03125, %v1071_v16  ;;  %v1068_v19 = vpop.xlane.xlu1 %1067  ;;  %v3606_v16 = vld [vmem:[%s3786_s3] sm:$0xff] }
 0xa94   :  { %v1073_v20 = vmul.f32 0.03125, %v1068_v19 }
 0xa95   :  { %v1076_v21 = vsub.f32 %v1063_v36, %v1074_v17 }
 0xa96   :  { %v1075_v22 = vsub.f32 %v1062_v11, %v1073_v20 }
 0xa97   :  { %v1078_v23 = vmul.f32 %v1076_v21, %v1076_v21 }
 0xa98   :  { %v1077_v24 = vmul.f32 %v1075_v22, %v1075_v22 }
 0xa99   :  { %v1082_v25 = vsel %vm48_vm0, %v1078_v23, 0.0 }
 0xa9a   :  { %1083 = vadd.xlane.f32.xlu1 %v1082_v25  ;;  %v1079_v8 = vsel %vm48_vm0, %v1077_v24, 0.0 }
 0xa9b   :  { %1080 = vadd.xlane.f32.xlu0 %v1079_v8 }
 0xaab   :  { %3110 = vrot.lane.b32.xlu1 %v3527_v29, %s3260_s0 }
 0xaaf   :  { %1215 = vrot.lane.b32.xlu1 %v3548_v26, %s3260_s0 }
 0xab1   :  { %3105 = vrot.lane.b32.xlu0 %v3537_v32, %s3260_s0 }
 0xb27   :  { %v1084_v27 = vpop.xlane.xlu1 %1083 }
 0xb28   :  { %v1086_v40 = vmul.f32 0.03125, %v1084_v27  ;;  %v1081_v0 = vpop.xlane.xlu0 %1080 }
 0xb29   :  { %v1085_v1 = vmul.f32 0.03125, %v1081_v0 }
 0xb2a   :  { %v1088_v2 = vadd.f32 1e-05, %v1086_v40 }
 0xb2b   :  { %v1087_v3 = vadd.f32 1e-05, %v1085_v1  ;;  %v3111_v5 = vpop.permute.xlu1 %3110 }
 0xb2c   :  { %3191 = vrsqrt.f32 %v1088_v2  ;;  %v3106_v14 = vpop.permute.xlu0 %3105  ;;  %v3113_v41 = vunpack.i.h.bf16 %v3111_v5  ;;  %v3112_v42 = vunpack.i.l.bf16 %v3111_v5 }
 0xb2d   :  { %3193 = vrsqrt.f32 %v1087_v3  ;;  %v3108_v43 = vunpack.i.h.bf16 %v3106_v14  ;;  %v3107_v38 = vunpack.i.l.bf16 %v3106_v14 }
 0xb2e   :  { %v2961_v45 = vpack.c.bf16 %v3113_v41, %v3112_v42 }
 0xb2f   :  { %v2957_v44 = vpack.c.bf16 %v3108_v43, %v3107_v38  ;;  %v1216_v56 = vpop.permute.xlu1 %1215 }
 0xb31   :  { %2958 = vmatprep.subr.bf16.mxu0 %v2957_v44 }
 0xb32   :  { %2960 = vmatpush3.bf16.msra.mxu0 %v2957_v44 }
 0xb33   :  { %2962 = vmatprep.subr.bf16.mxu0 %v2961_v45 }
 0xb36   :  { %v3192_v39 = vpop.eup %3191  ;;  %2964 = vmatpush3.bf16.msra.mxu0 %v2961_v45 }
 0xb37   :  { %v3194_v48 = vpop.eup %3193  ;;  %v1092_v49 = vmul.f32 %v3192_v39, %v1076_v21 }
 0xb38   :  { %v1091_v50 = vmul.f32 %v3194_v48, %v1075_v22 }
 0xb39   :  { %2794 = vmatmul.mubr.msk.f32.vlgmr.msra.gmra.mrb[10].mxu0 %vm48_vm0, %v36_v46  ;;  %v1098_v52 = vmul.f32 %v2539_v47, %v1092_v49 }
 0xb3a   :  { %v1097_v53 = vmul.f32 %v2539_v47, %v1091_v50 }
 0xb3b   :  { %v3564_v55 = vadd.f32 %v2540_v51, %v1098_v52 }
 0xb3c   :  { %v3562_v54 = vadd.f32 %v2540_v51, %v1097_v53 }
 0xb3e   :  { %2782 = vmatprep.mubr.msk.f32.mxu1 %vm48_vm0, %v3562_v54 }
 0xb3f   :  { %2783 = vmatmul.mubr.msk.f32.vlgmr.msra.gmra.mrb[10].mxu1 %vm48_vm0, %v3564_v55 }
 0xc0c   :  { %v2795_v57 = vpop.f32.mrb[10].mxu0 }
 0xc0d   :  { %v1296_v58 = vadd.f32 %v2795_v57, %v1216_v56  ;;  %v1290_v59 = vpop.f32.mrb[11].mxu0 }
 0xc0e   :  { %v1291_v60 = vadd.f32 %v1290_v59, %v1216_v56 }
 0xc10   :  { %v3570_v61 = vpack.i.bf16 %v1296_v58, %v1291_v60  ;;  %v2965_v62 = vpack.c.bf16 %v1296_v58, %v1291_v60 }
 0xc12   :  { %v2784_v63 = vpop.f32.mrb[10].mxu1  ;;  %3115 = vrot.lane.b32.xlu0 %v3570_v61, %s3259_s23  ;;  %2967 = vmatprep.subr.msk.bf16.mxu1 %vm3393_vm2, %v2965_v62 }
 0xc13   :  { %v3577_v9 = vadd.f32 %v2784_v63, %v3548_v26  ;;  %v1189_v4 = vpop.f32.mrb[11].mxu1  ;;  %2970 = vmatpush3.bf16.xpose.msk.msra.mxu1 %vm3393_vm2, %v2965_v62 }
 0xc14   :  { %v3582_v7 = vadd.f32 %v3548_v26, %v1189_v4 }
 0xc16   :  { %1495 = vrot.lane.b32.xlu1 %v3582_v7, %s3259_s23  ;;  %2800 = vmatprep.mubr.msk.f32.mxu1 %vm136_vm1, %v3582_v7 }
 0xc17   :  { %1497 = vrot.lane.b32.xlu0 %v3577_v9, %s3259_s23 }
 0xc1a   :  { %2801 = vmatmul.mubr.msk.f32.vlgmr.msra.gmra.mrb[12].mxu1 %vm136_vm1, %v3577_v9 }
 0xc84   :  { %v3116_v37 = vpop.permute.xlu0 %3115 }
 0xc85   :  { %v3118_v13 = vunpack.i.h.bf16 %v3116_v37  ;;  %v3117_v10 = vunpack.i.l.bf16 %v3116_v37 }
 0xc87   :  { %v2975_v36 = vpack.c.bf16 %v3118_v13, %v3117_v10 }
 0xc88   :  { %v1496_v11 = vpop.permute.xlu1 %1495 }
 0xc89   :  { %2977 = vmatprep.subr.msk.bf16.mxu1 %vm3393_vm2, %v2975_v36  ;;  %2814 = vmatprep.mubr.msk.f32.mxu1 %vm136_vm1, %v1496_v11  ;;  %v1498_v12 = vpop.permute.xlu0 %1497 }
 0xc8a   :  { %2980 = vmatpush3.bf16.xpose.msk.msra.mxu1 %vm3393_vm2, %v2975_v36 }
 0xc91   :  { %2815 = vmatmul.mubr.msk.f32.vlgmr.msra.gmra.mrb[14].mxu1 %vm136_vm1, %v1498_v12 }
 0xced   :  { %v2802_v17 = vpop.f32.mrb[12].mxu1 }
 0xcee   :  { %v1383_v19 = vadd.f32 %v2802_v17, %v3601_v15  ;;  %v1377_v20 = vpop.f32.mrb[13].mxu1 }
 0xcef   :  { %v1378_v21 = vadd.f32 %v1377_v20, %v3606_v16 }
 0xcf0   :  { %v1389_v22 = vsel %vm220_vm3, %v1383_v19, -inf }
 0xcf1   :  { %1390 = vmax.xlane.f32.xlu0 %v1389_v22  ;;  %v1386_v23 = vsel %vm220_vm3, %v1378_v21, -inf }
 0xcf2   :  { %1387 = vmax.xlane.f32.xlu1 %v1386_v23 }
 0xd64   :  { %v2816_v24 = vpop.f32.mrb[14].mxu1 }
 0xd65   :  { %v1583_v25 = vadd.f32 %v2816_v24, %v3601_v15  ;;  %v1577_v8 = vpop.f32.mrb[15].mxu1 }
 0xd66   :  { %v1578_v6 = vadd.f32 %v1577_v8, %v3606_v16 }
 0xd67   :  { %v1589_v28 = vsel %vm220_vm3, %v1583_v25, -inf }
 0xd68   :  { %1590 = vmax.xlane.f32.xlu1 %v1589_v28  ;;  %v1586_v30 = vsel %vm220_vm3, %v1578_v6, -inf }
 0xd69   :  { %1587 = vmax.xlane.f32.xlu0 %v1586_v30 }
 0xd7e   :  { %v1391_v31 = vpop.xlane.xlu0 %1390 }
 0xd7f   :  { %v1393_v33 = vsub.f32 %v1383_v19, %v1391_v31  ;;  %v1388_v34 = vpop.xlane.xlu1 %1387 }
 0xd80   :  { %v1392_v35 = vsub.f32 %v1378_v21, %v1388_v34 }
 0xd81   :  { %v1396_v27 = vmul.f32 1.442695, %v1393_v33 }
 0xd82   :  { %v1394_v40 = vmul.f32 1.442695, %v1392_v35 }
 0xd83   :  { %3195 = vpow2.f32 %v1396_v27 }
 0xd84   :  { %3197 = vpow2.f32 %v1394_v40 }
 0xd8d   :  { %v3196_v0 = vpop.eup %3195 }
 0xd8e   :  { %v3198_v1 = vpop.eup %3197  ;;  %v1401_v2 = vsel %vm220_vm3, %v3196_v0, 0.0 }
 0xd8f   :  { %1402 = vadd.xlane.f32.xlu1 %v1401_v2  ;;  %v1398_v3 = vsel %vm220_vm3, %v3198_v1, 0.0 }
 0xd90   :  { %1399 = vadd.xlane.f32.xlu0 %v1398_v3 }
 0xdf5   :  { %v1591_v5 = vpop.xlane.xlu1 %1590 }
 0xdf6   :  { %v1593_v14 = vsub.f32 %v1583_v25, %v1591_v5  ;;  %v1588_v41 = vpop.xlane.xlu0 %1587 }
 0xdf7   :  { %v1592_v42 = vsub.f32 %v1578_v6, %v1588_v41 }
 0xdf8   :  { %v1596_v43 = vmul.f32 1.442695, %v1593_v14 }
 0xdf9   :  { %v1594_v38 = vmul.f32 1.442695, %v1592_v42 }
 0xdfa   :  { %3199 = vpow2.f32 %v1596_v43 }
 0xdfb   :  { %3201 = vpow2.f32 %v1594_v38 }
 0xe04   :  { %v3200_v44 = vpop.eup %3199 }
 0xe05   :  { %v3202_v45 = vpop.eup %3201  ;;  %v1601_v39 = vsel %vm220_vm3, %v3200_v44, 0.0 }
 0xe06   :  { %1602 = vadd.xlane.f32.xlu1 %v1601_v39  ;;  %v1598_v46 = vsel %vm220_vm3, %v3202_v45, 0.0 }
 0xe07   :  { %1599 = vadd.xlane.f32.xlu0 %v1598_v46 }
 0xe17   :  { %3125 = vrot.lane.b32.xlu1 %v3570_v61, %s3261_s24 }
 0xe1b   :  { %3130 = vrot.lane.b32.xlu1 %v3570_v61, %s3265_s10 }
 0xe1c   :  { %v1403_v50 = vpop.xlane.xlu1 %1402 }
 0xe1d   :  { %3120 = vrot.lane.b32.xlu0 %v3570_v61, %s3260_s0  ;;  %v1400_v47 = vpop.xlane.xlu0 %1399 }
 0xe1e   :  { %3203 = vrcp.f32 %v1400_v47 }
 0xe1f   :  { %1697 = vrot.lane.b32.xlu1 %v3577_v9, %s3265_s10  ;;  %3205 = vrcp.f32 %v1403_v50 }
 0xe21   :  { %1695 = vrot.lane.b32.xlu0 %v3582_v7, %s3265_s10 }
 0xe28   :  { %v3204_v48 = vpop.eup %3203 }
 0xe29   :  { %v1406_v49 = vmul.f32 %v3204_v48, %v3198_v1  ;;  %v3206_v4 = vpop.eup %3205 }
 0xe2a   :  { %v1407_v11 = vmul.f32 %v3206_v4, %v3196_v0 }
 0xe2b   :  { %2807 = vmatprep.mubr.msk.f32.mxu0 %vm220_vm3, %v1406_v49 }
 0xe93   :  { %v1603_v51 = vpop.xlane.xlu1 %1602 }
 0xe94   :  { %v1600_v52 = vpop.xlane.xlu0 %1599 }
 0xe95   :  { %3207 = vrcp.f32 %v1600_v52 }
 0xe96   :  { %3209 = vrcp.f32 %v1603_v51 }
 0xe97   :  { %v3126_v53 = vpop.permute.xlu1 %3125 }
 0xe98   :  { %v3121_v56 = vpop.permute.xlu0 %3120  ;;  %v3128_v57 = vunpack.i.h.bf16 %v3126_v53  ;;  %v3127_v58 = vunpack.i.l.bf16 %v3126_v53 }
 0xe99   :  { %v3123_v59 = vunpack.i.h.bf16 %v3121_v56  ;;  %v3122_v60 = vunpack.i.l.bf16 %v3121_v56 }
 0xe9a   :  { %v2981_v37 = vpack.c.bf16 %v3128_v57, %v3127_v58 }
 0xe9b   :  { %v2971_v62 = vpack.c.bf16 %v3123_v59, %v3122_v60  ;;  %v3131_v63 = vpop.permute.xlu1 %3130 }
 0xe9c   :  { %v3133_v13 = vunpack.i.h.bf16 %v3131_v63  ;;  %v3132_v10 = vunpack.i.l.bf16 %v3131_v63  ;;  %v1696_v21 = vpop.permute.xlu0 %1695 }
 0xe9d   :  { %2972 = vmatprep.subr.bf16.mxu0 %v2971_v62 }
 0xe9e   :  { %2974 = vmatpush3.bf16.msra.mxu0 %v2971_v62  ;;  %v2985_v19 = vpack.c.bf16 %v3133_v13, %v3132_v10 }
 0xe9f   :  { %v3208_v36 = vpop.eup %3207  ;;  %2982 = vmatprep.subr.bf16.mxu0 %v2981_v37  ;;  %v1698_v22 = vpop.permute.xlu1 %1697 }
 0xea0   :  { %v3210_v12 = vpop.eup %3209  ;;  %v1606_v17 = vmul.f32 %v3208_v36, %v3202_v45 }
 0xea1   :  { %2808 = vmatmul.mubr.msk.f32.vlgmr.msra.gmra.mrb[12].mxu0 %vm220_vm3, %v1407_v11  ;;  %v1607_v20 = vmul.f32 %v3210_v12, %v3200_v44 }
 0xea2   :  { %2984 = vmatpush3.bf16.msra.mxu0 %v2981_v37  ;;  %2821 = vmatprep.mubr.msk.f32.mxu0 %vm220_vm3, %v1606_v17 }
 0xea3   :  { %2987 = vmatprep.subr.msk.bf16.mxu0 %vm3393_vm2, %v2985_v19 }
 0xea5   :  { %2822 = vmatmul.mubr.msk.f32.vlgmr.msra.gmra.mrb[14].mxu0 %vm220_vm3, %v1607_v20 }
 0xea6   :  { %2828 = vmatprep.mubr.msk.f32.mxu0 %vm136_vm1, %v1696_v21 }
 0xeab   :  { %2990 = vmatpush3.bf16.xpose.msk.msra.mxu0 %vm3393_vm2, %v2985_v19 }
 0xeb2   :  { %2829 = vmatmul.mubr.msk.f32.vlgmr.msra.gmra.mrb[16].mxu0 %vm136_vm1, %v1698_v22 }
 0xf74   :  { %v3640_v23 = vpop.f32.mrb[12].mxu0 }
 0xf75   :  { %v3642_v24 = vpop.f32.mrb[13].mxu0 }
 0xf78   :  { %v3644_v25 = vpop.f32.mrb[14].mxu0 }
 0xf79   :  { %v3646_v8 = vpop.f32.mrb[15].mxu0 }
 0xf85   :  { %v2830_v6 = vpop.f32.mrb[16].mxu0 }
 0xf86   :  { %v1783_v28 = vadd.f32 %v2830_v6, %v3601_v15  ;;  %v1777_v30 = vpop.f32.mrb[17].mxu0 }
 0xf87   :  { %v1778_v31 = vadd.f32 %v1777_v30, %v3606_v16 }
 0xf88   :  { %v1789_v33 = vsel %vm220_vm3, %v1783_v28, -inf }
 0xf89   :  { %1790 = vmax.xlane.f32.xlu1 %v1789_v33  ;;  %v1786_v34 = vsel %vm220_vm3, %v1778_v31, -inf }
 0xf8a   :  { %1787 = vmax.xlane.f32.xlu0 %v1786_v34 }
 0xf9a   :  { %3135 = vrot.lane.b32.xlu1 %v3570_v61, %s3263_s29 }
 0xf9e   :  { %1895 = vrot.lane.b32.xlu1 %v3582_v7, %s3267_s12 }
 0xfa2   :  { %1897 = vrot.lane.b32.xlu1 %v3577_v9, %s3267_s12 }
0x1016   :  { %v1791_v35 = vpop.xlane.xlu1 %1790 }
0x1017   :  { %v1793_v27 = vsub.f32 %v1783_v28, %v1791_v35  ;;  %v1788_v40 = vpop.xlane.xlu0 %1787 }
0x1018   :  { %v1792_v0 = vsub.f32 %v1778_v31, %v1788_v40 }
0x1019   :  { %v1796_v1 = vmul.f32 1.442695, %v1793_v27 }
0x101a   :  { %v1794_v2 = vmul.f32 1.442695, %v1792_v0  ;;  %v3136_v3 = vpop.permute.xlu1 %3135 }
0x101b   :  { %3211 = vpow2.f32 %v1796_v1  ;;  %v3138_v5 = vunpack.i.h.bf16 %v3136_v3  ;;  %v3137_v14 = vunpack.i.l.bf16 %v3136_v3 }
0x101c   :  { %3213 = vpow2.f32 %v1794_v2 }
0x101d   :  { %v2991_v41 = vpack.c.bf16 %v3138_v5, %v3137_v14 }
0x101e   :  { %v1896_v52 = vpop.permute.xlu1 %1895 }
0x101f   :  { %2992 = vmatprep.subr.bf16.mxu1 %v2991_v41 }
0x1020   :  { %2994 = vmatpush3.bf16.msra.mxu1 %v2991_v41 }
0x1022   :  { %v1898_v53 = vpop.permute.xlu1 %1897 }
0x1025   :  { %v3212_v42 = vpop.eup %3211 }
0x1026   :  { %v1801_v7 = vsel %vm220_vm3, %v3212_v42, 0.0  ;;  %v3214_v43 = vpop.eup %3213 }
0x1027   :  { %1802 = vadd.xlane.f32.xlu0 %v1801_v7  ;;  %v1798_v9 = vsel %vm220_vm3, %v3214_v43, 0.0 }
0x102b   :  { %1799 = vadd.xlane.f32.xlu0 %v1798_v9 }
0x1041   :  { %3140 = vrot.lane.b32.xlu0 %v3570_v61, %s3267_s12  ;;  %s3274_s12 = smov [#allocation2]  }
0x10b4   :  { %v1803_v38 = vpop.xlane.xlu0 %1802 }
0x10b5   :  { %3215 = vrcp.f32 %v1803_v38 }
0x10b8   :  { %v1800_v44 = vpop.xlane.xlu0 %1799 }
0x10b9   :  { %3217 = vrcp.f32 %v1800_v44 }
0x10bc   :  { %v3141_v45 = vpop.permute.xlu0 %3140 }
0x10bd   :  { %v3143_v39 = vunpack.i.h.bf16 %v3141_v45  ;;  %v3142_v46 = vunpack.i.l.bf16 %v3141_v45 }
0x10bf   :  { %v2995_v47 = vpack.c.bf16 %v3143_v39, %v3142_v46  ;;  %v3216_v48 = vpop.eup %3215 }
0x10c0   :  { %v1807_v51 = vmul.f32 %v3216_v48, %v3212_v42 }
0x10c1   :  { %2997 = vmatprep.subr.msk.bf16.mxu1 %vm3393_vm2, %v2995_v47 }
0x10c3   :  { %v3218_v49 = vpop.eup %3217 }
0x10c4   :  { %v1806_v50 = vmul.f32 %v3218_v49, %v3214_v43 }
0x10c6   :  { %2835 = vmatprep.mubr.msk.f32.mxu1 %vm220_vm3, %v1806_v50 }
0x10c7   :  { %2836 = vmatmul.mubr.msk.f32.vlgmr.msra.gmra.mrb[16].mxu1 %vm220_vm3, %v1807_v51 }
0x10c8   :  { %3000 = vmatpush3.bf16.xpose.msk.msra.mxu1 %vm3393_vm2, %v2995_v47  ;;  %2842 = vmatprep.mubr.msk.f32.mxu1 %vm136_vm1, %v1896_v52 }
0x10cf   :  { %2843 = vmatmul.mubr.msk.f32.vlgmr.msra.gmra.mrb[18].mxu1 %vm136_vm1, %v1898_v53 }
0x119a   :  { %v2837_v56 = vpop.f32.mrb[16].mxu1 }
0x119b   :  { %v1886_v57 = vpop.f32.mrb[17].mxu1 }
0x11a2   :  { %v2844_v58 = vpop.f32.mrb[18].mxu1 }
0x11a3   :  { %v1983_v59 = vadd.f32 %v2844_v58, %v3601_v15  ;;  %v1977_v60 = vpop.f32.mrb[19].mxu1 }
0x11a4   :  { %v1978_v62 = vadd.f32 %v1977_v60, %v3606_v16 }
0x11a5   :  { %v1989_v63 = vsel %vm220_vm3, %v1983_v59, -inf }
0x11a6   :  { %1990 = vmax.xlane.f32.xlu1 %v1989_v63  ;;  %v1986_v4 = vsel %vm220_vm3, %v1978_v62, -inf  ;;  %v2264_v63 = vld [vmem:[%s3789_s6 + $0x8] sm:$0xff] }
0x11a7   :  { %1987 = vmax.xlane.f32.xlu0 %v1986_v4 }
0x11b7   :  { %3145 = vrot.lane.b32.xlu1 %v3570_v61, %s3266_s11 }
0x11bb   :  { %3155 = vrot.lane.b32.xlu1 %v3527_v29, %s3269_s14 }
0x11bf   :  { %2097 = vrot.lane.b32.xlu1 %v3646_v8, %s3271_s16 }
0x11c3   :  { %2105 = vrot.lane.b32.xlu1 %v1886_v57, %s3272_s17 }
0x1233   :  { %v1991_v18 = vpop.xlane.xlu1 %1990 }
0x1234   :  { %v1993_v15 = vsub.f32 %v1983_v59, %v1991_v18  ;;  %v1988_v16 = vpop.xlane.xlu0 %1987  ;;  %v2265_v18 = vld [vmem:[%s3789_s6 + $0x10] sm:$0xff] }
0x1235   :  { %v1992_v37 = vsub.f32 %v1978_v62, %v1988_v16 }
0x1236   :  { %v1996_v13 = vmul.f32 1.442695, %v1993_v15  ;;  %v2266_v15 = vld [vmem:[%s3789_s6 + $0x18] sm:$0xff] }
0x1237   :  { %v1994_v10 = vmul.f32 1.442695, %v1992_v37  ;;  %v3146_v36 = vpop.permute.xlu1 %3145  ;;  %v3017_v16 = vpack.c.bf16 %v2266_v15, %v2265_v18  ;;  %v2357_v37 = vld [vmem:[%s3790_s7] sm:$0xff] }
0x1238   :  { %v3148_v11 = vunpack.i.h.bf16 %v3146_v36  ;;  %v3147_v12 = vunpack.i.l.bf16 %v3146_v36  ;;  %v2584_v18 = vld [vmem:[%s3788_s5 + $0x2] ss:$0 sm:$0xff] }
0x1239   :  { %3219 = vpow2.f32 %v1994_v10  ;;  %v2359_v10 = vld [vmem:[%s3790_s7 + $0x10] sm:$0xff] }
0x123a   :  { %v3001_v17 = vpack.c.bf16 %v3148_v11, %v3147_v12  ;;  %3221 = vpow2.f32 %v1996_v13  ;;  %v2358_v13 = vld [vmem:[%s3790_s7 + $0x8] sm:$0xff]  ;;  %v2360_v11 = vld [vmem:[%s3790_s7 + $0x18] sm:$0xff] }
0x123b   :  { %v3156_v31 = vpop.permute.xlu1 %3155  ;;  %v3021_v36 = vpack.c.bf16 %v2358_v13, %v2357_v37  ;;  %v3025_v12 = vpack.c.bf16 %v2360_v11, %v2359_v10 }
0x123c   :  { %3002 = vmatprep.subr.bf16.mxu0 %v3001_v17  ;;  %v3158_v34 = vunpack.i.h.bf16 %v3156_v31  ;;  %v3157_v35 = vunpack.i.l.bf16 %v3156_v31 }
0x123d   :  { %3004 = vmatpush3.bf16.msra.mxu0 %v3001_v17  ;;  %v2361_v17 = vld [vmem:[%s3790_s7 + $0x20] sm:$0xff] }
0x123f   :  { %v2098_v3 = vpop.permute.xlu1 %2097 }
0x1240   :  { %v2119_v41 = vsel %vm136_vm1, %v3642_v24, %v2098_v3 }
0x1243   :  { %v3220_v29 = vpop.eup %3219  ;;  %v2106_v14 = vpop.permute.xlu1 %2105 }
0x1244   :  { %v1998_v61 = vsel %vm220_vm3, %v3220_v29, 0.0  ;;  %v3222_v19 = vpop.eup %3221  ;;  %v2121_v7 = vsel %vm220_vm3, %v2119_v41, %v2106_v14 }
0x1245   :  { %1999 = vadd.xlane.f32.xlu0 %v1998_v61  ;;  %v2001_v20 = vsel %vm220_vm3, %v3222_v19, 0.0 }
0x1249   :  { %2002 = vadd.xlane.f32.xlu0 %v2001_v20 }
0x125f   :  { %3150 = vrot.lane.b32.xlu0 %v3537_v32, %s3269_s14 }
0x1263   :  { %2099 = vrot.lane.b32.xlu0 %v3644_v25, %s3271_s16  ;;  %v3009_v25 = vpack.c.bf16 %v3158_v34, %v3157_v35 }
0x1267   :  { %2107 = vrot.lane.b32.xlu0 %v2837_v56, %s3272_s17 }
0x12d2   :  { %v2000_v21 = vpop.xlane.xlu0 %1999 }
0x12d3   :  { %3223 = vrcp.f32 %v2000_v21 }
0x12d6   :  { %v2003_v22 = vpop.xlane.xlu0 %2002 }
0x12d7   :  { %3225 = vrcp.f32 %v2003_v22 }
0x12da   :  { %v3151_v8 = vpop.permute.xlu0 %3150 }
0x12db   :  { %v3153_v6 = vunpack.i.h.bf16 %v3151_v8  ;;  %v3152_v28 = vunpack.i.l.bf16 %v3151_v8 }
0x12dd   :  { %v3224_v30 = vpop.eup %3223  ;;  %v3005_v33 = vpack.c.bf16 %v3153_v6, %v3152_v28 }
0x12de   :  { %v2006_v27 = vmul.f32 %v3224_v30, %v3220_v29  ;;  %v2100_v2 = vpop.permute.xlu0 %2099  ;;  %v2362_v29 = vld [vmem:[%s3790_s7 + $0x28] sm:$0xff]  ;;  %v2577_v30 = vld [vmem:[%s3788_s5 + $0x1] ss:$0 sm:$0xff] }
0x12df   :  { %3006 = vmatprep.subr.bf16.mxu0 %v3005_v33  ;;  %v2120_v43 = vsel %vm136_vm1, %v3640_v23, %v2100_v2  ;;  %v3029_v61 = vpack.c.bf16 %v2362_v29, %v2361_v17  ;;  %v2364_v2 = vld [vmem:[%s3790_s7 + $0x38] sm:$0xff] }
0x12e0   :  { %2849 = vmatprep.mubr.msk.f32.mxu0 %vm220_vm3, %v2006_v27 }
0x12e1   :  { %v3226_v32 = vpop.eup %3225 }
0x12e2   :  { %v2007_v40 = vmul.f32 %v3226_v32, %v3222_v19  ;;  %v2108_v5 = vpop.permute.xlu0 %2107 }
0x12e3   :  { %v2122_v38 = vsel %vm220_vm3, %v2120_v43, %v2108_v5 }
0x12e4   :  { %2850 = vmatmul.mubr.msk.f32.vlgmr.msra.gmra.mrb[18].mxu0 %vm220_vm3, %v2007_v40 }
0x12e5   :  { %3008 = vmatpush3.bf16.msra.mxu0 %v3005_v33  ;;  %v2578_v33 = vld [vmem:[%s3788_s5 + $0x4] ss:$0 sm:$0xff] }
0x12e6   :  { %3010 = vmatprep.subr.bf16.mxu0 %v3009_v25 }
0x12e9   :  { %3012 = vmatpush3.bf16.msra.mxu0 %v3009_v25 }
0x12ea   :  { %3022 = vmatprep.subr.bf16.mxu0 %v3021_v36 }
0x13b7   :  { %v2851_v0 = vpop.f32.mrb[18].mxu0 }
0x13b8   :  { %2115 = vrot.lane.b32.xlu0 %v2851_v0, %s3273_s18  ;;  %v2086_v1 = vpop.f32.mrb[19].mxu0  ;;  %v2579_v0 = vld [vmem:[%s3791_s8] ss:$0 sm:$0xff] }
0x13b9   :  { %2113 = vrot.lane.b32.xlu1 %v2086_v1, %s3273_s18  ;;  %v2363_v1 = vld [vmem:[%s3790_s7 + $0x30] sm:$0xff] }
0x13ba   :  { %v3033_v3 = vpack.c.bf16 %v2364_v2, %v2363_v1 }
0x13bd   :  { %2137 = vrot.lane.b32.xlu1 %v3548_v26, %s3269_s14  ;;  %s2499_s14 = sshll.u32 %s3274_s12, 4  ;;  %s2500_s14 = int_to_ptr.vmem [resolvable:$true] %s2499_s14 }
0x13be   :  { %s3235_s17 = scalar_lea.vmem %s2500_s14, 256  ;;  %p3240_p1 = scmp.lt.s32.totalorder %s2500_s14, %s2500_s14 }
0x13bf   :  { %p3236_p0 = scmp.ne.s32.totalorder %s2500_s14, %s3235_s17  ;;  %p3241_p2 = scmp.lt.s32.totalorder %s3235_s17, %s3235_s17 }
0x13c1   :  { %p3242_p3 = por %p3241_p2, %p3240_p1 }
0x13c3   :  { %p3243_p4 = pnand %p3242_p3, %p3236_p0 }
0x142a   :  { %v2116_v42 = vpop.permute.xlu0 %2115 }
0x142b   :  { %v2114_v9 = vpop.permute.xlu1 %2113  ;;  %v2124_v26 = vsel %vm958_vm4, %v2122_v38, %v2116_v42 }
0x142c   :  { %v2123_v44 = vsel %vm958_vm4, %v2121_v7, %v2114_v9 }
0x142d   :  { %2860 = vmatprep.mubr.msk.f32.mxu0 %vm48_vm0, %v2123_v44 }
0x142e   :  { %2861 = vmatmul.mubr.msk.f32.vlgmr.msra.gmra.mrb[20].mxu0 %vm48_vm0, %v2124_v26 }
0x142f   :  { %v2138_v45 = vpop.permute.xlu1 %2137  ;;  %3024 = vmatpush3.bf16.msra.mxu0 %v3021_v36 }
0x1430   :  { %3026 = vmatprep.subr.bf16.mxu0 %v3025_v12 }
0x1433   :  { %3028 = vmatpush3.bf16.msra.mxu0 %v3025_v12 }
0x1434   :  { %3030 = vmatprep.subr.bf16.mxu0 %v3029_v61 }
0x1437   :  { %3032 = vmatpush3.bf16.msra.mxu0 %v3029_v61 }
0x1438   :  { %3034 = vmatprep.subr.bf16.mxu0 %v3033_v3 }
0x143b   :  { %3036 = vmatpush3.bf16.msra.mxu0 %v3033_v3 }
0x1501   :  { %v2862_v39 = vpop.f32.mrb[20].mxu0 }
0x1502   :  { %v2218_v24 = vadd.f32 %v2862_v39, %v2138_v45  ;;  %v2212_v46 = vpop.f32.mrb[21].mxu0 }
0x1503   :  { %v2213_v47 = vadd.f32 %v2212_v46, %v2138_v45 }
0x1504   :  { %v2222_v48 = vadd.f32 %v2218_v24, %v3564_v55 }
0x1505   :  { %v2221_v23 = vadd.f32 %v2213_v47, %v3562_v54  ;;  %v2263_v54 = vld [vmem:[%s3789_s6] sm:$0xff] }
0x1506   :  { %v2228_v49 = vsel %vm48_vm0, %v2222_v48, 0.0  ;;  %v3013_v4 = vpack.c.bf16 %v2264_v63, %v2263_v54 }
0x1507   :  { %2229 = vadd.xlane.f32.xlu1 %v2228_v49  ;;  %v2225_v50 = vsel %vm48_vm0, %v2221_v23, 0.0 }
0x1508   :  { %2226 = vadd.xlane.f32.xlu0 %v2225_v50  ;;  %3014 = vmatprep.subr.bf16.mxu1 %v3013_v4 }
0x1509   :  { %3016 = vmatpush3.bf16.msra.mxu1 %v3013_v4 }
0x150a   :  { %3018 = vmatprep.subr.bf16.mxu1 %v3017_v16 }
0x150d   :  { %3020 = vmatpush3.bf16.msra.mxu1 %v3017_v16  ;;  %v2585_v16 = vld [vmem:[%s3788_s5 + $0x5] ss:$0 sm:$0xff] }
0x1518   :  { %2365 = vrot.lane.b32.xlu1 %v2579_v0, %s3262_s2 }
0x1594   :  { %v2230_v51 = vpop.xlane.xlu1 %2229 }
0x1595   :  { %v2232_v52 = vmul.f32 0.03125, %v2230_v51  ;;  %v2227_v53 = vpop.xlane.xlu0 %2226 }
0x1596   :  { %v2231_v56 = vmul.f32 0.03125, %v2227_v53 }
0x1597   :  { %v2234_v57 = vsub.f32 %v2222_v48, %v2232_v52 }
0x1598   :  { %v2233_v58 = vsub.f32 %v2221_v23, %v2231_v56  ;;  %v2366_v9 = vpop.permute.xlu1 %2365 }
0x1599   :  { %v2236_v62 = vmul.f32 %v2234_v57, %v2234_v57 }
0x159a   :  { %v2235_v59 = vmul.f32 %v2233_v58, %v2233_v58 }
0x159b   :  { %v2240_v55 = vsel %vm48_vm0, %v2236_v62, 0.0 }
0x159c   :  { %v2237_v60 = vsel %vm48_vm0, %v2235_v59, 0.0 }
0x159d   :  { %2238 = vadd.xlane.f32.xlu0 %v2237_v60 }
0x15a1   :  { %2241 = vadd.xlane.f32.xlu0 %v2240_v55 }
0x162a   :  { %v2239_v19 = vpop.xlane.xlu0 %2238 }
0x162b   :  { %v2243_v20 = vmul.f32 0.03125, %v2239_v19 }
0x162d   :  { %v2245_v21 = vadd.f32 1e-05, %v2243_v20 }
0x162e   :  { %v2242_v22 = vpop.xlane.xlu0 %2241 }
0x162f   :  { %3227 = vrsqrt.f32 %v2245_v21  ;;  %v2244_v8 = vmul.f32 0.03125, %v2242_v22 }
0x1631   :  { %v2246_v6 = vadd.f32 1e-05, %v2244_v8 }
0x1633   :  { %3229 = vrsqrt.f32 %v2246_v6 }
0x1639   :  { %v3228_v28 = vpop.eup %3227 }
0x163a   :  { %v2249_v31 = vmul.f32 %v3228_v28, %v2233_v58 }
0x163c   :  { %v2255_v34 = vmul.f32 %v2577_v30, %v2249_v31 }
0x163d   :  { %v3230_v35 = vpop.eup %3229 }
0x163e   :  { %v2250_v27 = vmul.f32 %v3230_v35, %v2234_v57  ;;  %v2261_v32 = vadd.f32 %v2578_v33, %v2255_v34 }
0x1640   :  { %v2256_v25 = vmul.f32 %v2577_v30, %v2250_v27  ;;  %2871 = vmatprep.mubr.msk.f32.mxu1 %vm48_vm0, %v2261_v32 }
0x1642   :  { %v2262_v40 = vadd.f32 %v2578_v33, %v2256_v25 }
0x1644   :  { %2872 = vmatmul.mubr.msk.f32.vlgmr.msra.gmra.mrb[20].mxu1 %vm48_vm0, %v2262_v40 }
0x1717   :  { %v2873_v5 = vpop.f32.mrb[20].mxu1 }
0x1718   :  { %v2352_v14 = vadd.f32 %v2873_v5, %v2579_v0  ;;  %v2346_v41 = vpop.f32.mrb[21].mxu1 }
0x1719   :  { %v2347_v42 = vadd.f32 %v2579_v0, %v2346_v41 }
0x171a   :  { %v2356_v43 = vmax.f32 %v2352_v14, 0.0 }
0x171b   :  { %v2355_v7 = vmax.f32 %v2347_v42, 0.0 }
0x171d   :  { %2890 = vmatprep.mubr.msk.f32.mxu0 %vm2368_vm5, %v2355_v7 }
0x171e   :  { %2891 = vmatmul.mubr.msk.f32.vlgmr.msra.gmra.mrb[22].mxu0 %vm2368_vm5, %v2356_v43 }
0x17f1   :  { %v2892_v38 = vpop.f32.mrb[22].mxu0 }
0x17f2   :  { %v2441_v44 = vpop.f32.mrb[23].mxu0  ;;  %v2447_v26 = vadd.f32 %v2892_v38, %v2366_v9 }
0x17f3   :  { %v2442_v45 = vadd.f32 %v2441_v44, %v2366_v9 }
0x17f4   :  { %v2451_v46 = vadd.f32 %v2447_v26, %v2262_v40 }
0x17f5   :  { %v2450_v39 = vadd.f32 %v2442_v45, %v2261_v32 }
0x17f6   :  { %v2457_v47 = vsel %vm48_vm0, %v2451_v46, 0.0 }
0x17f7   :  { %v2454_v24 = vsel %vm48_vm0, %v2450_v39, 0.0 }
0x17f8   :  { %2455 = vadd.xlane.f32.xlu0 %v2454_v24 }
0x17fc   :  { %2458 = vadd.xlane.f32.xlu0 %v2457_v47 }
0x1885   :  { %v2456_v48 = vpop.xlane.xlu0 %2455 }
0x1886   :  { %v2460_v23 = vmul.f32 0.03125, %v2456_v48 }
0x1888   :  { %v2462_v49 = vsub.f32 %v2450_v39, %v2460_v23 }
0x1889   :  { %v2459_v50 = vpop.xlane.xlu0 %2458 }
0x188a   :  { %v2461_v51 = vmul.f32 0.03125, %v2459_v50  ;;  %v2464_v52 = vmul.f32 %v2462_v49, %v2462_v49 }
0x188c   :  { %v2463_v53 = vsub.f32 %v2451_v46, %v2461_v51  ;;  %v2466_v56 = vsel %vm48_vm0, %v2464_v52, 0.0 }
0x188d   :  { %2467 = vadd.xlane.f32.xlu0 %v2466_v56 }
0x188e   :  { %v2465_v57 = vmul.f32 %v2463_v53, %v2463_v53 }
0x1890   :  { %v2469_v58 = vsel %vm48_vm0, %v2465_v57, 0.0 }
0x1891   :  { %2470 = vadd.xlane.f32.xlu0 %v2469_v58 }
0x191a   :  { %v2468_v59 = vpop.xlane.xlu0 %2467 }
0x191b   :  { %v2472_v60 = vmul.f32 0.03125, %v2468_v59 }
0x191d   :  { %v2474_v62 = vadd.f32 1e-05, %v2472_v60 }
0x191e   :  { %v2471_v55 = vpop.xlane.xlu0 %2470 }
0x191f   :  { %3231 = vrsqrt.f32 %v2474_v62  ;;  %v2473_v54 = vmul.f32 0.03125, %v2471_v55 }
0x1921   :  { %v2475_v63 = vadd.f32 1e-05, %v2473_v54 }
0x1923   :  { %3233 = vrsqrt.f32 %v2475_v63 }
0x1929   :  { %v3232_v4 = vpop.eup %3231 }
0x192a   :  { %v2478_v15 = vmul.f32 %v3232_v4, %v2462_v49 }
0x192c   :  { %v2484_v37 = vmul.f32 %v2584_v18, %v2478_v15 }
0x192d   :  { %v3234_v13 = vpop.eup %3233 }
0x192e   :  { %v2479_v10 = vmul.f32 %v3234_v13, %v2463_v53  ;;  %v2490_v36 = vadd.f32 %v2585_v16, %v2484_v37 }
0x1930   :  { %v2485_v11 = vmul.f32 %v2584_v18, %v2479_v10  ;;  %2492 = vst.msk [vmem:[#allocation2] sm:$0xff] %vm48_vm0, %v2490_v36 }
0x1932   :  { %v2491_v12 = vadd.f32 %v2585_v16, %v2485_v11 }
0x1934   :  { %2493 = vst.msk [vmem:[#allocation2 + $0x8] sm:$0xff] %vm48_vm0, %v2491_v12 }
0x1935   :  { %3246 = shalt.err (!%p3243_p4)
}
0x1936   :  { %s3247_s30 = scalar_lea.hbm %s3792_s9, 256 }
0x1937   :  { %p3248_p5 = scmp.ne.s32.totalorder %s3792_s9, %s3247_s30  ;;  %p3251_p6 = scmp.lt.u32.totalorder %s3247_s30, %s3792_s9 }
0x1939   :  { %p3253_p7 = pnand %p3251_p6, %p3248_p5 }
0x193b   :  { %3256 = shalt.err (!%p3253_p7)
}
0x193c   :  { %s3275_s20 = smov 128  }
0x193d   :  { %2505 = dma.vmem_to_hbm [thread:$0]  %s2500_s14, 256, %s3792_s9, [#allocation3], %s3275_s20, %s3275_s20, %s3271_s16  }
0x193e   :  { %3257 = dma.done.wait [#allocation3], 256  }
0x193f   :  { %3258 = vsyncadd [#allocation3], 4294967040 }
0x1940   :  { %2509 = vsyncpa [#allocation3], 1 }

</bundles_post_ra>
